<compile_context>
chip_gen: v7x
topology: tpu7x:2x2x1
jax: 0.10.0
libtpu: 0.0.40
codegen_flags: <defaults>
</compile_context>

<pallas_src>
import functools
import math

import jax
import jax.numpy as jnp
from jax.experimental import pallas as pl
from jax.experimental.pallas import tpu as pltpu

D_MODEL = 32
N_HEADS = 2
HEAD_DIM = D_MODEL // N_HEADS
D_FF = 64
LN_EPS = 1e-5


def _round_up(x, m):
    return (x + m - 1) // m * m


def _layernorm(h, w, b):
    mean = jnp.mean(h, axis=-1, keepdims=True)
    var = jnp.mean((h - mean) ** 2, axis=-1, keepdims=True)
    return (h - mean) * jax.lax.rsqrt(var + LN_EPS) * w + b


def encoder_kernel(
    ids_ref,               # (TB*S, 1) int32 token ids
    emb_ref,               # (V, D)   embedding table (row 0 = padding = 0)
    wqkv_ref, bqkv_ref,    # (D, 3D), (1, 3D)   (pre-transposed)
    wo_ref, bo_ref,        # (D, D),  (1, D)    (pre-transposed)
    ln1w_ref, ln1b_ref,    # (1, D),  (1, D)
    w1_ref, b1_ref,        # (D, F),  (1, F)    (pre-transposed)
    w2_ref, b2_ref,        # (F, D),  (1, D)    (pre-transposed)
    ln2w_ref, ln2b_ref,    # (1, D),  (1, D)
    out_ref,               # (TB, D)
    *, seq_len,
):
    TB = out_ref.shape[0]
    S = seq_len
    N = TB * S
    V = emb_ref.shape[0]

    # ---- embedding lookup as a one-hot matmul (table stays in VMEM) ----
    ids = ids_ref[...]                                            # (N, 1) int32
    vocab_iota = jax.lax.broadcasted_iota(jnp.int32, (N, V), 1)   # (N, V)
    onehot = (ids == vocab_iota).astype(jnp.float32)
    x = jnp.dot(onehot, emb_ref[...],
                preferred_element_type=jnp.float32)               # (N, D)

    # ---- QKV projection (weights already transposed for the MXU) ----
    qkv = jnp.dot(x, wqkv_ref[...],
                  preferred_element_type=jnp.float32) + bqkv_ref[...]   # (N, 3D)
    qkv3 = qkv.reshape(TB, S, 3 * D_MODEL)

    # ---- 2-head scaled-dot-product attention, batched over TB ----
    scale = 1.0 / math.sqrt(HEAD_DIM)
    wo = wo_ref[...]
    attn = jnp.zeros((N, D_MODEL), jnp.float32)
    for h in range(N_HEADS):            # N_HEADS = 2: short static loop, no concat
        q = qkv3[:, :, h * HEAD_DIM:(h + 1) * HEAD_DIM]
        k = qkv3[:, :, D_MODEL + h * HEAD_DIM:D_MODEL + (h + 1) * HEAD_DIM]
        v = qkv3[:, :, 2 * D_MODEL + h * HEAD_DIM:2 * D_MODEL + (h + 1) * HEAD_DIM]
        s = jnp.einsum('bqd,bkd->bqk', q, k,
                       preferred_element_type=jnp.float32) * scale       # (TB,S,S)
        s = s - jnp.max(s, axis=-1, keepdims=True)
        e = jnp.exp(s)
        p = e * pl.reciprocal(jnp.sum(e, axis=-1, keepdims=True), approx=True)
        o = jnp.einsum('bqk,bkd->bqd', p, v,
                       preferred_element_type=jnp.float32)               # (TB,S,hd)
        # Fold the per-head output projection: each head hits its own slice of
        # W_o, so head outputs never need to be re-concatenated along lanes.
        attn = attn + jnp.dot(o.reshape(N, HEAD_DIM),
                              wo[h * HEAD_DIM:(h + 1) * HEAD_DIM, :],
                              preferred_element_type=jnp.float32)
    attn = attn + bo_ref[...]

    # ---- residual + LayerNorm 1 (PyTorch default norm_first=False) ----
    h1 = _layernorm(x + attn, ln1w_ref[...], ln1b_ref[...])

    # ---- feed-forward: linear1 -> ReLU -> linear2 ----
    ff = jnp.maximum(
        jnp.dot(h1, w1_ref[...], preferred_element_type=jnp.float32)
        + b1_ref[...], 0.0)
    ff = jnp.dot(ff, w2_ref[...],
                 preferred_element_type=jnp.float32) + b2_ref[...]

    # ---- residual + LayerNorm 2 ----
    h2 = _layernorm(h1 + ff, ln2w_ref[...], ln2b_ref[...])

    # ---- AdaptiveAvgPool1d(1): mean over sequence, (TB, D) slab per step ----
    out_ref[...] = jnp.sum(h2.reshape(TB, S, D_MODEL), axis=1) * (1.0 / S)


def protein_encoder_forward(tokens, params, tokens_per_step=2048):
    """tokens: (B, S) int token ids -> (B, D_MODEL) pooled encodings."""
    B, S = tokens.shape
    tokens = tokens.astype(jnp.int32)

    # Sequences per grid step: big enough to amortize per-step pipeline
    # overhead and fill MXU sublanes, capped so the resident tiles stay well
    # under the smallest (v7x, 64 MiB) VMEM budget on every generation.
    tb = max(8, min(256, (tokens_per_step // max(S, 1)) // 8 * 8))
    tb = min(tb, _round_up(B, 8))
    b_pad = _round_up(B, tb)
    if b_pad != B:
        # pad with token 0 (padding_idx); padded rows are sliced off below.
        tokens = jnp.concatenate(
            [tokens, jnp.zeros((b_pad - B, S), jnp.int32)], axis=0)

    ids = tokens.reshape(b_pad * S, 1)   # ids only: 4 B/token of HBM traffic

    # Pre-transpose weights once on the host; the MXU consumes them directly.
    weights = [
        params["embedding"],
        params["wqkv"].T, params["bqkv"],
        params["wo"].T, params["bo"],
        params["ln1w"], params["ln1b"],
        params["w1"].T, params["b1"],
        params["w2"].T, params["b2"],
        params["ln2w"], params["ln2b"],
    ]
    weights = [w.astype(jnp.float32) for w in weights]

    in_specs = [pl.BlockSpec((tb * S, 1), lambda b: (b, 0))]
    in_specs += [pl.BlockSpec(w.shape, lambda b: (0, 0)) for w in weights]

    out = pl.pallas_call(
        functools.partial(encoder_kernel, seq_len=S),
        out_shape=jax.ShapeDtypeStruct((b_pad, D_MODEL), jnp.float32),
        grid=(b_pad // tb,),
        in_specs=in_specs,
        out_specs=pl.BlockSpec((tb, D_MODEL), lambda b: (b, 0)),
        compiler_params=pltpu.CompilerParams(
            dimension_semantics=("parallel",)),
    )(ids, *weights)
    return out[:B]


def init_params(vocab_size, key):
    ks = jax.random.split(key, 9)

    def u(k, shape, scale=0.1):
        return jax.random.uniform(k, shape, jnp.float32, -1.0, 1.0) * scale

    emb = u(ks[0], (vocab_size, D_MODEL), 1.0)
    emb = emb.at[0].set(0.0)  # padding_idx=0

    return dict(
        embedding=emb,
        wqkv=u(ks[1], (3 * D_MODEL, D_MODEL)),
        bqkv=u(ks[2], (1, 3 * D_MODEL)),
        wo=u(ks[3], (D_MODEL, D_MODEL)),
        bo=u(ks[4], (1, D_MODEL)),
        ln1w=jnp.ones((1, D_MODEL), jnp.float32),
        ln1b=jnp.zeros((1, D_MODEL), jnp.float32),
        w1=u(ks[5], (D_FF, D_MODEL)),
        b1=u(ks[6], (1, D_FF)),
        w2=u(ks[7], (D_MODEL, D_FF)),
        b2=u(ks[8], (1, D_MODEL)),
        ln2w=jnp.ones((1, D_MODEL), jnp.float32),
        ln2b=jnp.zeros((1, D_MODEL), jnp.float32),
    )


def reference_forward(tokens, params):
    """Pure-JAX reference matching PyTorch eval-mode semantics (exact softmax)."""
    x = params["embedding"][tokens].astype(jnp.float32)   # (B, S, D)

    def one(xb):
        qkv = xb @ params["wqkv"].T + params["bqkv"][0]
        q, k, v = (qkv[:, :D_MODEL], qkv[:, D_MODEL:2 * D_MODEL],
                   qkv[:, 2 * D_MODEL:])
        outs = []
        for h in range(N_HEADS):
            sl = slice(h * HEAD_DIM, (h + 1) * HEAD_DIM)
            s = (q[:, sl] @ k[:, sl].T) / math.sqrt(HEAD_DIM)
            p = jax.nn.softmax(s, axis=-1)
            outs.append(p @ v[:, sl])
        attn = jnp.concatenate(outs, axis=-1) @ params["wo"].T + params["bo"][0]
        h1 = _layernorm(xb + attn, params["ln1w"][0], params["ln1b"][0])
        ff = jnp.maximum(h1 @ params["w1"].T + params["b1"][0], 0.0)
        ff = ff @ params["w2"].T + params["b2"][0]
        h2 = _layernorm(h1 + ff, params["ln2w"][0], params["ln2b"][0])
        return jnp.mean(h2, axis=0)

    return jax.vmap(one)(x)


if __name__ == "__main__":
    key = jax.random.PRNGKey(0)
    kp, kt = jax.random.split(key)

    VOCAB = 21          # 20 amino acids + padding token 0
    B, S = 2, 8

    params = init_params(VOCAB, kp)
    tokens = jax.random.randint(kt, (B, S), 0, VOCAB, dtype=jnp.int32)

    out = protein_encoder_forward(tokens, params)
    out = jax.block_until_ready(out)

    assert out.shape == (B, D_MODEL), out.shape
    ref = reference_forward(tokens, params)
    err = float(jnp.max(jnp.abs(out - ref)))
    # tolerance loosened slightly vs exact math because the kernel uses the
    # EUP approximate reciprocal for the softmax normalization.
    if err > 3e-3:
        raise AssertionError(f"Pallas output mismatch vs reference: {err}")

    # TODO(synk): no src_key_padding_mask, matching the original PyTorch module
    # (padding tokens attend and count toward the mean pool there as well).

    print("KERNEL_OK")
</pallas_src>

<mosaic_0001>
module attributes {stable_mosaic.version = 11 : i64} {
  func.func @encoder_kernel(%arg0: i32, %arg1: memref<64x1xi32, #tpu.memory_space<vmem>>, %arg2: memref<21x32xf32, #tpu.memory_space<vmem>>, %arg3: memref<32x96xf32, #tpu.memory_space<vmem>>, %arg4: memref<1x96xf32, #tpu.memory_space<vmem>>, %arg5: memref<32x32xf32, #tpu.memory_space<vmem>>, %arg6: memref<1x32xf32, #tpu.memory_space<vmem>>, %arg7: memref<1x32xf32, #tpu.memory_space<vmem>>, %arg8: memref<1x32xf32, #tpu.memory_space<vmem>>, %arg9: memref<32x64xf32, #tpu.memory_space<vmem>>, %arg10: memref<1x64xf32, #tpu.memory_space<vmem>>, %arg11: memref<64x32xf32, #tpu.memory_space<vmem>>, %arg12: memref<1x32xf32, #tpu.memory_space<vmem>>, %arg13: memref<1x32xf32, #tpu.memory_space<vmem>>, %arg14: memref<1x32xf32, #tpu.memory_space<vmem>>, %arg15: memref<8x32xf32, #tpu.memory_space<vmem>>) attributes {dimension_semantics = [#tpu.dimension_semantics<parallel>], iteration_bounds = array<i64: 1>, scalar_prefetch = 0 : i64, scratch_operands = 0 : i64, tpu.core_type = #tpu.core_type<tc>, window_params = [{transform_indices = @transform_0, window_bounds = array<i64: 64, 1>}, {pipeline_mode = #tpu.pipeline_mode<synchronous>, transform_indices = @transform_1, window_bounds = array<i64: 21, 32>}, {pipeline_mode = #tpu.pipeline_mode<synchronous>, transform_indices = @transform_2, window_bounds = array<i64: 32, 96>}, {pipeline_mode = #tpu.pipeline_mode<synchronous>, transform_indices = @transform_3, window_bounds = array<i64: 1, 96>}, {pipeline_mode = #tpu.pipeline_mode<synchronous>, transform_indices = @transform_4, window_bounds = array<i64: 32, 32>}, {pipeline_mode = #tpu.pipeline_mode<synchronous>, transform_indices = @transform_5, window_bounds = array<i64: 1, 32>}, {pipeline_mode = #tpu.pipeline_mode<synchronous>, transform_indices = @transform_6, window_bounds = array<i64: 1, 32>}, {pipeline_mode = #tpu.pipeline_mode<synchronous>, transform_indices = @transform_7, window_bounds = array<i64: 1, 32>}, {pipeline_mode = #tpu.pipeline_mode<synchronous>, transform_indices = @transform_8, window_bounds = array<i64: 32, 64>}, {pipeline_mode = #tpu.pipeline_mode<synchronous>, transform_indices = @transform_9, window_bounds = array<i64: 1, 64>}, {pipeline_mode = #tpu.pipeline_mode<synchronous>, transform_indices = @transform_10, window_bounds = array<i64: 64, 32>}, {pipeline_mode = #tpu.pipeline_mode<synchronous>, transform_indices = @transform_11, window_bounds = array<i64: 1, 32>}, {pipeline_mode = #tpu.pipeline_mode<synchronous>, transform_indices = @transform_12, window_bounds = array<i64: 1, 32>}, {pipeline_mode = #tpu.pipeline_mode<synchronous>, transform_indices = @transform_13, window_bounds = array<i64: 1, 32>}, {transform_indices = @transform_14, window_bounds = array<i64: 8, 32>}]} {
    %c0 = arith.constant 0 : index
    %c0_0 = arith.constant 0 : index
    %0 = vector.load %arg1[%c0, %c0_0] : memref<64x1xi32, #tpu.memory_space<vmem>>, vector<64x1xi32>
    %1 = tpu.iota {dimensions = array<i32: 1>} : vector<64x21xi32>
    %2 = vector.broadcast %0 : vector<64x1xi32> to vector<64x21xi32>
    %3 = arith.cmpi eq, %2, %1 : vector<64x21xi32>
    %4 = arith.extui %3 : vector<64x21xi1> to vector<64x21xi32>
    %5 = arith.sitofp %4 : vector<64x21xi32> to vector<64x21xf32>
    %c0_1 = arith.constant 0 : index
    %c0_2 = arith.constant 0 : index
    %6 = vector.load %arg2[%c0_1, %c0_2] : memref<21x32xf32, #tpu.memory_space<vmem>>, vector<21x32xf32>
    %cst = arith.constant dense<0.000000e+00> : vector<64x32xf32>
    %7 = tpu.matmul %5, %6, %cst {dimension_numbers = #tpu.dot_dimension_numbers<[1], [0], [0], [1], [0, 0, 1, 1], [], []>} : vector<64x21xf32>, vector<21x32xf32>, vector<64x32xf32> -> vector<64x32xf32>
    %c0_3 = arith.constant 0 : index
    %c0_4 = arith.constant 0 : index
    %8 = vector.load %arg3[%c0_3, %c0_4] : memref<32x96xf32, #tpu.memory_space<vmem>>, vector<32x96xf32>
    %cst_5 = arith.constant dense<0.000000e+00> : vector<64x96xf32>
    %9 = tpu.matmul %7, %8, %cst_5 {dimension_numbers = #tpu.dot_dimension_numbers<[1], [0], [0], [1], [0, 0, 1, 1], [], []>} : vector<64x32xf32>, vector<32x96xf32>, vector<64x96xf32> -> vector<64x96xf32>
    %c0_6 = arith.constant 0 : index
    %c0_7 = arith.constant 0 : index
    %10 = vector.load %arg4[%c0_6, %c0_7] : memref<1x96xf32, #tpu.memory_space<vmem>>, vector<1x96xf32>
    %11 = vector.broadcast %10 : vector<1x96xf32> to vector<64x96xf32>
    %12 = arith.addf %9, %11 : vector<64x96xf32>
    %13 = vector.shape_cast %12 : vector<64x96xf32> to vector<8x8x96xf32>
    %c0_8 = arith.constant 0 : index
    %c0_9 = arith.constant 0 : index
    %14 = vector.load %arg5[%c0_8, %c0_9] : memref<32x32xf32, #tpu.memory_space<vmem>>, vector<32x32xf32>
    %cst_10 = arith.constant 0.000000e+00 : f32
    %15 = vector.broadcast %cst_10 : f32 to vector<64x32xf32>
    %16 = vector.extract_strided_slice %13 {offsets = [0, 0, 0], sizes = [8, 8, 16], strides = [1, 1, 1]} : vector<8x8x96xf32> to vector<8x8x16xf32>
    %17 = vector.extract_strided_slice %13 {offsets = [0, 0, 32], sizes = [8, 8, 16], strides = [1, 1, 1]} : vector<8x8x96xf32> to vector<8x8x16xf32>
    %18 = vector.extract_strided_slice %13 {offsets = [0, 0, 64], sizes = [8, 8, 16], strides = [1, 1, 1]} : vector<8x8x96xf32> to vector<8x8x16xf32>
    "tpu.trace_start"() <{level = 10 : i32, message = "bqd,bkd->bqk"}> : () -> ()
    %cst_11 = arith.constant dense<0.000000e+00> : vector<8x8x8xf32>
    %19 = tpu.matmul %16, %17, %cst_11 {dimension_numbers = #tpu.dot_dimension_numbers<[2], [2], [1], [1], [0, 0, 0, 1, 1, 1], [0], [0]>} : vector<8x8x16xf32>, vector<8x8x16xf32>, vector<8x8x8xf32> -> vector<8x8x8xf32>
    "tpu.trace_stop"() : () -> ()
    %cst_12 = arith.constant 2.500000e-01 : f32
    %20 = vector.broadcast %cst_12 : f32 to vector<8x8x8xf32>
    %21 = arith.mulf %19, %20 : vector<8x8x8xf32>
    %cst_13 = arith.constant dense<0xFF800000> : vector<8x8xf32>
    %22 = vector.multi_reduction <maximumf>, %21, %cst_13 [2] : vector<8x8x8xf32> to vector<8x8xf32>
    %23 = vector.shape_cast %22 : vector<8x8xf32> to vector<8x8x1xf32>
    %24 = vector.broadcast %23 : vector<8x8x1xf32> to vector<8x8x8xf32>
    %25 = arith.subf %21, %24 : vector<8x8x8xf32>
    %26 = math.exp %25 : vector<8x8x8xf32>
    %cst_14 = arith.constant dense<0.000000e+00> : vector<8x8xf32>
    %27 = vector.multi_reduction <add>, %26, %cst_14 [2] : vector<8x8x8xf32> to vector<8x8xf32>
    %28 = vector.shape_cast %27 : vector<8x8xf32> to vector<8x8x1xf32>
    %29 = tpu.reciprocal %28 {approx = true} : vector<8x8x1xf32> -> vector<8x8x1xf32>
    %30 = vector.broadcast %29 : vector<8x8x1xf32> to vector<8x8x8xf32>
    %31 = arith.mulf %26, %30 : vector<8x8x8xf32>
    "tpu.trace_start"() <{level = 10 : i32, message = "bqk,bkd->bqd"}> : () -> ()
    %cst_15 = arith.constant dense<0.000000e+00> : vector<8x8x16xf32>
    %32 = tpu.matmul %31, %18, %cst_15 {dimension_numbers = #tpu.dot_dimension_numbers<[2], [1], [1], [2], [0, 0, 0, 1, 1, 2], [0], [0]>} : vector<8x8x8xf32>, vector<8x8x16xf32>, vector<8x8x16xf32> -> vector<8x8x16xf32>
    "tpu.trace_stop"() : () -> ()
    %33 = vector.shape_cast %32 : vector<8x8x16xf32> to vector<64x16xf32>
    %34 = vector.extract_strided_slice %14 {offsets = [0, 0], sizes = [16, 32], strides = [1, 1]} : vector<32x32xf32> to vector<16x32xf32>
    %cst_16 = arith.constant dense<0.000000e+00> : vector<64x32xf32>
    %35 = tpu.matmul %33, %34, %cst_16 {dimension_numbers = #tpu.dot_dimension_numbers<[1], [0], [0], [1], [0, 0, 1, 1], [], []>} : vector<64x16xf32>, vector<16x32xf32>, vector<64x32xf32> -> vector<64x32xf32>
    %36 = arith.addf %15, %35 : vector<64x32xf32>
    %37 = vector.extract_strided_slice %13 {offsets = [0, 0, 16], sizes = [8, 8, 16], strides = [1, 1, 1]} : vector<8x8x96xf32> to vector<8x8x16xf32>
    %38 = vector.extract_strided_slice %13 {offsets = [0, 0, 48], sizes = [8, 8, 16], strides = [1, 1, 1]} : vector<8x8x96xf32> to vector<8x8x16xf32>
    %39 = vector.extract_strided_slice %13 {offsets = [0, 0, 80], sizes = [8, 8, 16], strides = [1, 1, 1]} : vector<8x8x96xf32> to vector<8x8x16xf32>
    "tpu.trace_start"() <{level = 10 : i32, message = "bqd,bkd->bqk"}> : () -> ()
    %cst_17 = arith.constant dense<0.000000e+00> : vector<8x8x8xf32>
    %40 = tpu.matmul %37, %38, %cst_17 {dimension_numbers = #tpu.dot_dimension_numbers<[2], [2], [1], [1], [0, 0, 0, 1, 1, 1], [0], [0]>} : vector<8x8x16xf32>, vector<8x8x16xf32>, vector<8x8x8xf32> -> vector<8x8x8xf32>
    "tpu.trace_stop"() : () -> ()
    %cst_18 = arith.constant 2.500000e-01 : f32
    %41 = vector.broadcast %cst_18 : f32 to vector<8x8x8xf32>
    %42 = arith.mulf %40, %41 : vector<8x8x8xf32>
    %cst_19 = arith.constant dense<0xFF800000> : vector<8x8xf32>
    %43 = vector.multi_reduction <maximumf>, %42, %cst_19 [2] : vector<8x8x8xf32> to vector<8x8xf32>
    %44 = vector.shape_cast %43 : vector<8x8xf32> to vector<8x8x1xf32>
    %45 = vector.broadcast %44 : vector<8x8x1xf32> to vector<8x8x8xf32>
    %46 = arith.subf %42, %45 : vector<8x8x8xf32>
    %47 = math.exp %46 : vector<8x8x8xf32>
    %cst_20 = arith.constant dense<0.000000e+00> : vector<8x8xf32>
    %48 = vector.multi_reduction <add>, %47, %cst_20 [2] : vector<8x8x8xf32> to vector<8x8xf32>
    %49 = vector.shape_cast %48 : vector<8x8xf32> to vector<8x8x1xf32>
    %50 = tpu.reciprocal %49 {approx = true} : vector<8x8x1xf32> -> vector<8x8x1xf32>
    %51 = vector.broadcast %50 : vector<8x8x1xf32> to vector<8x8x8xf32>
    %52 = arith.mulf %47, %51 : vector<8x8x8xf32>
    "tpu.trace_start"() <{level = 10 : i32, message = "bqk,bkd->bqd"}> : () -> ()
    %cst_21 = arith.constant dense<0.000000e+00> : vector<8x8x16xf32>
    %53 = tpu.matmul %52, %39, %cst_21 {dimension_numbers = #tpu.dot_dimension_numbers<[2], [1], [1], [2], [0, 0, 0, 1, 1, 2], [0], [0]>} : vector<8x8x8xf32>, vector<8x8x16xf32>, vector<8x8x16xf32> -> vector<8x8x16xf32>
    "tpu.trace_stop"() : () -> ()
    %54 = vector.shape_cast %53 : vector<8x8x16xf32> to vector<64x16xf32>
    %55 = vector.extract_strided_slice %14 {offsets = [16, 0], sizes = [16, 32], strides = [1, 1]} : vector<32x32xf32> to vector<16x32xf32>
    %cst_22 = arith.constant dense<0.000000e+00> : vector<64x32xf32>
    %56 = tpu.matmul %54, %55, %cst_22 {dimension_numbers = #tpu.dot_dimension_numbers<[1], [0], [0], [1], [0, 0, 1, 1], [], []>} : vector<64x16xf32>, vector<16x32xf32>, vector<64x32xf32> -> vector<64x32xf32>
    %57 = arith.addf %36, %56 : vector<64x32xf32>
    %c0_23 = arith.constant 0 : index
    %c0_24 = arith.constant 0 : index
    %58 = vector.load %arg6[%c0_23, %c0_24] : memref<1x32xf32, #tpu.memory_space<vmem>>, vector<1x32xf32>
    %59 = vector.broadcast %58 : vector<1x32xf32> to vector<64x32xf32>
    %60 = arith.addf %57, %59 : vector<64x32xf32>
    %61 = arith.addf %7, %60 : vector<64x32xf32>
    %c0_25 = arith.constant 0 : index
    %c0_26 = arith.constant 0 : index
    %62 = vector.load %arg7[%c0_25, %c0_26] : memref<1x32xf32, #tpu.memory_space<vmem>>, vector<1x32xf32>
    %c0_27 = arith.constant 0 : index
    %c0_28 = arith.constant 0 : index
    %63 = vector.load %arg8[%c0_27, %c0_28] : memref<1x32xf32, #tpu.memory_space<vmem>>, vector<1x32xf32>
    %cst_29 = arith.constant dense<0.000000e+00> : vector<64xf32>
    %64 = vector.multi_reduction <add>, %61, %cst_29 [1] : vector<64x32xf32> to vector<64xf32>
    %65 = vector.shape_cast %64 : vector<64xf32> to vector<64x1xf32>
    %cst_30 = arith.constant 3.200000e+01 : f32
    %66 = vector.broadcast %cst_30 : f32 to vector<64x1xf32>
    %67 = arith.divf %65, %66 : vector<64x1xf32>
    %68 = vector.broadcast %67 : vector<64x1xf32> to vector<64x32xf32>
    %69 = arith.subf %61, %68 : vector<64x32xf32>
    %70 = arith.mulf %69, %69 : vector<64x32xf32>
    %cst_31 = arith.constant dense<0.000000e+00> : vector<64xf32>
    %71 = vector.multi_reduction <add>, %70, %cst_31 [1] : vector<64x32xf32> to vector<64xf32>
    %72 = vector.shape_cast %71 : vector<64xf32> to vector<64x1xf32>
    %cst_32 = arith.constant 3.200000e+01 : f32
    %73 = vector.broadcast %cst_32 : f32 to vector<64x1xf32>
    %74 = arith.divf %72, %73 : vector<64x1xf32>
    %75 = vector.broadcast %67 : vector<64x1xf32> to vector<64x32xf32>
    %76 = arith.subf %61, %75 : vector<64x32xf32>
    %cst_33 = arith.constant 9.99999974E-6 : f32
    %77 = vector.broadcast %cst_33 : f32 to vector<64x1xf32>
    %78 = arith.addf %74, %77 : vector<64x1xf32>
    %79 = math.rsqrt %78 : vector<64x1xf32>
    %80 = vector.broadcast %79 : vector<64x1xf32> to vector<64x32xf32>
    %81 = arith.mulf %76, %80 : vector<64x32xf32>
    %82 = vector.broadcast %62 : vector<1x32xf32> to vector<64x32xf32>
    %83 = arith.mulf %81, %82 : vector<64x32xf32>
    %84 = vector.broadcast %63 : vector<1x32xf32> to vector<64x32xf32>
    %85 = arith.addf %83, %84 : vector<64x32xf32>
    %c0_34 = arith.constant 0 : index
    %c0_35 = arith.constant 0 : index
    %86 = vector.load %arg9[%c0_34, %c0_35] : memref<32x64xf32, #tpu.memory_space<vmem>>, vector<32x64xf32>
    %cst_36 = arith.constant dense<0.000000e+00> : vector<64x64xf32>
    %87 = tpu.matmul %85, %86, %cst_36 {dimension_numbers = #tpu.dot_dimension_numbers<[1], [0], [0], [1], [0, 0, 1, 1], [], []>} : vector<64x32xf32>, vector<32x64xf32>, vector<64x64xf32> -> vector<64x64xf32>
    %c0_37 = arith.constant 0 : index
    %c0_38 = arith.constant 0 : index
    %88 = vector.load %arg10[%c0_37, %c0_38] : memref<1x64xf32, #tpu.memory_space<vmem>>, vector<1x64xf32>
    %89 = vector.broadcast %88 : vector<1x64xf32> to vector<64x64xf32>
    %90 = arith.addf %87, %89 : vector<64x64xf32>
    %cst_39 = arith.constant 0.000000e+00 : f32
    %91 = vector.broadcast %cst_39 : f32 to vector<64x64xf32>
    %92 = arith.maximumf %90, %91 : vector<64x64xf32>
    %c0_40 = arith.constant 0 : index
    %c0_41 = arith.constant 0 : index
    %93 = vector.load %arg11[%c0_40, %c0_41] : memref<64x32xf32, #tpu.memory_space<vmem>>, vector<64x32xf32>
    %cst_42 = arith.constant dense<0.000000e+00> : vector<64x32xf32>
    %94 = tpu.matmul %92, %93, %cst_42 {dimension_numbers = #tpu.dot_dimension_numbers<[1], [0], [0], [1], [0, 0, 1, 1], [], []>} : vector<64x64xf32>, vector<64x32xf32>, vector<64x32xf32> -> vector<64x32xf32>
    %c0_43 = arith.constant 0 : index
    %c0_44 = arith.constant 0 : index
    %95 = vector.load %arg12[%c0_43, %c0_44] : memref<1x32xf32, #tpu.memory_space<vmem>>, vector<1x32xf32>
    %96 = vector.broadcast %95 : vector<1x32xf32> to vector<64x32xf32>
    %97 = arith.addf %94, %96 : vector<64x32xf32>
    %98 = arith.addf %85, %97 : vector<64x32xf32>
    %c0_45 = arith.constant 0 : index
    %c0_46 = arith.constant 0 : index
    %99 = vector.load %arg13[%c0_45, %c0_46] : memref<1x32xf32, #tpu.memory_space<vmem>>, vector<1x32xf32>
    %c0_47 = arith.constant 0 : index
    %c0_48 = arith.constant 0 : index
    %100 = vector.load %arg14[%c0_47, %c0_48] : memref<1x32xf32, #tpu.memory_space<vmem>>, vector<1x32xf32>
    %cst_49 = arith.constant dense<0.000000e+00> : vector<64xf32>
    %101 = vector.multi_reduction <add>, %98, %cst_49 [1] : vector<64x32xf32> to vector<64xf32>
    %102 = vector.shape_cast %101 : vector<64xf32> to vector<64x1xf32>
    %cst_50 = arith.constant 3.200000e+01 : f32
    %103 = vector.broadcast %cst_50 : f32 to vector<64x1xf32>
    %104 = arith.divf %102, %103 : vector<64x1xf32>
    %105 = vector.broadcast %104 : vector<64x1xf32> to vector<64x32xf32>
    %106 = arith.subf %98, %105 : vector<64x32xf32>
    %107 = arith.mulf %106, %106 : vector<64x32xf32>
    %cst_51 = arith.constant dense<0.000000e+00> : vector<64xf32>
    %108 = vector.multi_reduction <add>, %107, %cst_51 [1] : vector<64x32xf32> to vector<64xf32>
    %109 = vector.shape_cast %108 : vector<64xf32> to vector<64x1xf32>
    %cst_52 = arith.constant 3.200000e+01 : f32
    %110 = vector.broadcast %cst_52 : f32 to vector<64x1xf32>
    %111 = arith.divf %109, %110 : vector<64x1xf32>
    %112 = vector.broadcast %104 : vector<64x1xf32> to vector<64x32xf32>
    %113 = arith.subf %98, %112 : vector<64x32xf32>
    %cst_53 = arith.constant 9.99999974E-6 : f32
    %114 = vector.broadcast %cst_53 : f32 to vector<64x1xf32>
    %115 = arith.addf %111, %114 : vector<64x1xf32>
    %116 = math.rsqrt %115 : vector<64x1xf32>
    %117 = vector.broadcast %116 : vector<64x1xf32> to vector<64x32xf32>
    %118 = arith.mulf %113, %117 : vector<64x32xf32>
    %119 = vector.broadcast %99 : vector<1x32xf32> to vector<64x32xf32>
    %120 = arith.mulf %118, %119 : vector<64x32xf32>
    %121 = vector.broadcast %100 : vector<1x32xf32> to vector<64x32xf32>
    %122 = arith.addf %120, %121 : vector<64x32xf32>
    %123 = vector.shape_cast %122 : vector<64x32xf32> to vector<8x8x32xf32>
    %cst_54 = arith.constant dense<0.000000e+00> : vector<8x32xf32>
    %124 = vector.multi_reduction <add>, %123, %cst_54 [1] : vector<8x8x32xf32> to vector<8x32xf32>
    %cst_55 = arith.constant 1.250000e-01 : f32
    %125 = vector.broadcast %cst_55 : f32 to vector<8x32xf32>
    %126 = arith.mulf %124, %125 : vector<8x32xf32>
    %c0_56 = arith.constant 0 : index
    %c0_57 = arith.constant 0 : index
    %127 = vector.load %arg15[%c0_56, %c0_57] : memref<8x32xf32, #tpu.memory_space<vmem>>, vector<8x32xf32>
    tpu.vector_store %arg15[%c0_56, %c0_57], %126 {strides = array<i32>} : memref<8x32xf32, #tpu.memory_space<vmem>>, vector<8x32xf32>,
    return
  }
  func.func @transform_0(%arg0: i32) -> (i32, i32) {
    %c0_i32 = arith.constant 0 : i32
    %c0_i32_0 = arith.constant 0 : i32
    return %arg0, %c0_i32 : i32, i32
  }
  func.func @transform_1(%arg0: i32) -> (i32, i32) {
    %c0_i32 = arith.constant 0 : i32
    %c0_i32_0 = arith.constant 0 : i32
    %c0_i32_1 = arith.constant 0 : i32
    return %c0_i32, %c0_i32_0 : i32, i32
  }
  func.func @transform_2(%arg0: i32) -> (i32, i32) {
    %c0_i32 = arith.constant 0 : i32
    %c0_i32_0 = arith.constant 0 : i32
    %c0_i32_1 = arith.constant 0 : i32
    return %c0_i32, %c0_i32_0 : i32, i32
  }
  func.func @transform_3(%arg0: i32) -> (i32, i32) {
    %c0_i32 = arith.constant 0 : i32
    %c0_i32_0 = arith.constant 0 : i32
    %c0_i32_1 = arith.constant 0 : i32
    return %c0_i32, %c0_i32_0 : i32, i32
  }
  func.func @transform_4(%arg0: i32) -> (i32, i32) {
    %c0_i32 = arith.constant 0 : i32
    %c0_i32_0 = arith.constant 0 : i32
    %c0_i32_1 = arith.constant 0 : i32
    return %c0_i32, %c0_i32_0 : i32, i32
  }
  func.func @transform_5(%arg0: i32) -> (i32, i32) {
    %c0_i32 = arith.constant 0 : i32
    %c0_i32_0 = arith.constant 0 : i32
    %c0_i32_1 = arith.constant 0 : i32
    return %c0_i32, %c0_i32_0 : i32, i32
  }
  func.func @transform_6(%arg0: i32) -> (i32, i32) {
    %c0_i32 = arith.constant 0 : i32
    %c0_i32_0 = arith.constant 0 : i32
    %c0_i32_1 = arith.constant 0 : i32
    return %c0_i32, %c0_i32_0 : i32, i32
  }
  func.func @transform_7(%arg0: i32) -> (i32, i32) {
    %c0_i32 = arith.constant 0 : i32
    %c0_i32_0 = arith.constant 0 : i32
    %c0_i32_1 = arith.constant 0 : i32
    return %c0_i32, %c0_i32_0 : i32, i32
  }
  func.func @transform_8(%arg0: i32) -> (i32, i32) {
    %c0_i32 = arith.constant 0 : i32
    %c0_i32_0 = arith.constant 0 : i32
    %c0_i32_1 = arith.constant 0 : i32
    return %c0_i32, %c0_i32_0 : i32, i32
  }
  func.func @transform_9(%arg0: i32) -> (i32, i32) {
    %c0_i32 = arith.constant 0 : i32
    %c0_i32_0 = arith.constant 0 : i32
    %c0_i32_1 = arith.constant 0 : i32
    return %c0_i32, %c0_i32_0 : i32, i32
  }
  func.func @transform_10(%arg0: i32) -> (i32, i32) {
    %c0_i32 = arith.constant 0 : i32
    %c0_i32_0 = arith.constant 0 : i32
    %c0_i32_1 = arith.constant 0 : i32
    return %c0_i32, %c0_i32_0 : i32, i32
  }
  func.func @transform_11(%arg0: i32) -> (i32, i32) {
    %c0_i32 = arith.constant 0 : i32
    %c0_i32_0 = arith.constant 0 : i32
    %c0_i32_1 = arith.constant 0 : i32
    return %c0_i32, %c0_i32_0 : i32, i32
  }
  func.func @transform_12(%arg0: i32) -> (i32, i32) {
    %c0_i32 = arith.constant 0 : i32
    %c0_i32_0 = arith.constant 0 : i32
    %c0_i32_1 = arith.constant 0 : i32
    return %c0_i32, %c0_i32_0 : i32, i32
  }
  func.func @transform_13(%arg0: i32) -> (i32, i32) {
    %c0_i32 = arith.constant 0 : i32
    %c0_i32_0 = arith.constant 0 : i32
    %c0_i32_1 = arith.constant 0 : i32
    return %c0_i32, %c0_i32_0 : i32, i32
  }
  func.func @transform_14(%arg0: i32) -> (i32, i32) {
    %c0_i32 = arith.constant 0 : i32
    %c0_i32_0 = arith.constant 0 : i32
    return %arg0, %c0_i32 : i32, i32
  }
}

</mosaic_0001>

<bundles_post_ra>
// kernel: tpu_custom_call.1
= control target key start
LH: loop header
LB: loop body
LE: loop exit
PB: predicated region body
PF: predicated region fallthrough
CT: control target
= control target key end

     0   :  { %v4700_v2 = vmov 0   ;;  %s5518_s0 = inlined_call_operand.vmem [shape: s32[64,1], index: 0, kind: input, shape index: {}]   ;;  %s5519_s1 = inlined_call_operand.vmem [shape: f32[21,32], index: 1, kind: input, shape index: {}]   ;;  %s5520_s2 = inlined_call_operand.vmem [shape: f32[32,96], index: 2, kind: input, shape index: {}]   ;;  %s5521_s3 = inlined_call_operand.vmem [shape: f32[1,96], index: 3, kind: input, shape index: {}]   ;;  %s5522_s4 = inlined_call_operand.vmem [shape: f32[32,32], index: 4, kind: input, shape index: {}]   ;;  %s5523_s5 = inlined_call_operand.vmem [shape: f32[1,32], index: 5, kind: input, shape index: {}]   ;;  %s5524_s6 = inlined_call_operand.vmem [shape: f32[1,32], index: 6, kind: input, shape index: {}]   ;;  %s5525_s7 = inlined_call_operand.vmem [shape: f32[1,32], index: 7, kind: input, shape index: {}]   ;;  %s5526_s8 = inlined_call_operand.vmem [shape: f32[32,64], index: 8, kind: input, shape index: {}]   ;;  %s5527_s9 = inlined_call_operand.vmem [shape: f32[1,64], index: 9, kind: input, shape index: {}]   ;;  %s5528_s10 = inlined_call_operand.vmem [shape: f32[64,32], index: 10, kind: input, shape index: {}]   ;;  %s5529_s11 = inlined_call_operand.vmem [shape: f32[1,32], index: 11, kind: input, shape index: {}]   ;;  %s5530_s12 = inlined_call_operand.vmem [shape: f32[1,32], index: 12, kind: input, shape index: {}]   ;;  %s5531_s13 = inlined_call_operand.vmem [shape: f32[1,32], index: 13, kind: input, shape index: {}]   ;;  %s5532_s14 = inlined_call_operand.hbm [shape: f32[8,32], index: 14, kind: output, shape index: {}]  }
   0x1   :  { %v48_v0 = vld [vmem:[%s5518_s0] sm:$0xff]  ;;  %v50_v1 = vld [vmem:[%s5518_s0 + $0x10] sm:$0xff]  ;;  %4578 = vset.pattern.permute.xlu0 %v4700_v2  ;;  %4579 = vset.pattern.permute.xlu1 %v4700_v2  ;;  %v49_v3 = vld [vmem:[%s5518_s0 + $0x8] sm:$0xff] }
   0x2   :  { %59 = vperm.xlu0 %4578, %v48_v0   ;;  %65 = vperm.xlu1 %4579, %v50_v1   ;;  %v106_v4 = vld [vmem:[%s5519_s1] sm:$0xff]  ;;  %v51_v5 = vld [vmem:[%s5518_s0 + $0x18] sm:$0xff]  ;;  %v107_v6 = vld [vmem:[%s5519_s1 + $0x8] sm:$0xff] }
   0x3   :  { %19 = vsyncpa [#allocation3], 0  ;;  %v4517_v7 = vpack.c.bf16 %v107_v6, %v106_v4  ;;  %v108_v8 = vld [vmem:[%s5519_s1 + $0x10] sm:$0x1f]  ;;  %vm134_vm0 = vcmask 1044480   ;;  %v52_v9 = vld [vmem:[%s5518_s0 + $0x20] sm:$0xff]  ;;  %v56_v20 = vlaneseq }
   0x4   :  { %v53_v10 = vld [vmem:[%s5518_s0 + $0x28] sm:$0xff]  ;;  %v54_v11 = vld [vmem:[%s5518_s0 + $0x30] sm:$0xff]  ;;  %v55_v12 = vld [vmem:[%s5518_s0 + $0x38] sm:$0xff]  ;;  %v4701_v13 = vmov 0.0   ;;  %vm109_vm1 = vcmask 171008   ;;  %vm254_vm10 = vcmask 261120  }
   0x5   :  { %4518 = vmatprep.subr.bf16.mxu0 %v4517_v7  ;;  %v243_v14 = vld [vmem:[%s5520_s2] sm:$0xff]  ;;  %v244_v15 = vld [vmem:[%s5520_s2 + $0x8] sm:$0xff]  ;;  %v245_v16 = vld [vmem:[%s5520_s2 + $0x10] sm:$0xff]  ;;  %v57_v21 = vand.u32 127, %v56_v20  ;;  %vm4702_vm11 = vmmov 0   ;;  %s4703_s26 = smov 96  }
   0x6   :  { %62 = vperm.xlu0 %4578, %v49_v3   ;;  %68 = vperm.xlu1 %4579, %v51_v5   ;;  %v4521_v17 = vpack.c.bf16 %v244_v15, %v243_v14  ;;  %v246_v18 = vld [vmem:[%s5520_s2 + $0x18] sm:$0xff]  ;;  %v4008_v46 = vld [vmem:[%s5521_s3] ss:$0 sm:$0xff]  ;;  %s4704_s3 = smov 64   ;;  %s4705_s27 = smov 80   ;;  %vm391_vm12 = vcmask 130048  }
   0x7   :  { %4520 = vmatpush3.bf16.msra.mxu0 %v4517_v7  ;;  %v4525_v19 = vpack.c.bf16 %v246_v18, %v245_v16  ;;  %s4706_s28 = smov 112   ;;  %vm1013_vm13 = vcmask 64512   ;;  %s4707_s29 = smov 48   ;;  %vm3617_vm14 = vcmask 523264   ;;  %vm3961_vm15 = vcmask 1041409  }
   0x8   :  { %4243 = vmatprep.subr.msk.mxu0 %vm134_vm0, %v108_v8  ;;  %4522 = vmatprep.subr.bf16.mxu1 %v4521_v17 }
   0x9   :  { %4524 = vmatpush3.bf16.msra.mxu1 %v4521_v17 }
   0xa   :  { %71 = vperm.xlu0 %4578, %v52_v9   ;;  %74 = vperm.xlu1 %4579, %v53_v10  }
   0xb   :  { %4244 = vmatpush3.msk.msra.mxu0 %vm134_vm0, %v108_v8  ;;  %4526 = vmatprep.subr.bf16.mxu1 %v4525_v19  ;;  %vm3963_vm0 = vcmask 1042434  }
   0xc   :  { %4277 = vmatprep.subr.mxu0 %v4701_v13 }
   0xd   :  { %4528 = vmatpush3.bf16.msra.mxu1 %v4525_v19 }
   0xe   :  { %77 = vperm.xlu0 %4578, %v54_v11   ;;  %80 = vperm.xlu1 %4579, %v55_v12  }
   0xf   :  { %4292 = vmatprep.subr.mxu1 %v4701_v13 }
  0x81   :  { %v60_v22 = vpop.permute.xlu0 %59  ;;  %v66_v23 = vpop.permute.xlu1 %65 }
  0x82   :  { %vm82_vm2 = vcmp.eq.s32.totalorder %v60_v22, %v57_v21  ;;  %vm84_vm3 = vcmp.eq.s32.totalorder %v66_v23, %v57_v21 }
  0x83   :  { %v3991_v24 = vsel %vm82_vm2, 1.0, %v4701_v13  ;;  %v3993_v27 = vsel %vm84_vm3, 1.0, %v4701_v13  ;;  %vm3967_vm2 = vcmask 1044484   ;;  %vm3969_vm3 = vcmask 1045509  }
  0x84   :  { %4245 = vmatprep.mubr.msk.f32.mxu0 %vm109_vm1, %v3991_v24 }
  0x85   :  { %v63_v25 = vpop.permute.xlu0 %62  ;;  %v69_v26 = vpop.permute.xlu1 %68 }
  0x86   :  { %vm83_vm4 = vcmp.eq.s32.totalorder %v63_v25, %v57_v21  ;;  %vm85_vm5 = vcmp.eq.s32.totalorder %v69_v26, %v57_v21 }
  0x87   :  { %v3992_v28 = vsel %vm83_vm4, 1.0, %v4701_v13  ;;  %v3994_v29 = vsel %vm85_vm5, 1.0, %v4701_v13  ;;  %vm3971_vm4 = vcmask 1046534   ;;  %vm3973_vm5 = vcmask 1047559  }
  0x88   :  { %4246 = vmatmul.mubr.msk.f32.vlgmr.msra.gmra.mrb[0].mxu0 %vm109_vm1, %v3992_v28 }
  0x89   :  { %v72_v30 = vpop.permute.xlu0 %71  ;;  %4248 = vmatprep.mubr.msk.f32.mxu0 %vm109_vm1, %v3993_v27  ;;  %v75_v31 = vpop.permute.xlu1 %74 }
  0x8a   :  { %vm86_vm6 = vcmp.eq.s32.totalorder %v72_v30, %v57_v21  ;;  %vm87_vm7 = vcmp.eq.s32.totalorder %v75_v31, %v57_v21 }
  0x8b   :  { %v3995_v32 = vsel %vm86_vm6, 1.0, %v4701_v13  ;;  %v3996_v33 = vsel %vm87_vm7, 1.0, %v4701_v13 }
  0x8c   :  { %4249 = vmatmul.mubr.msk.f32.gmra.mrb[2].mxu0 %vm109_vm1, %v3994_v29 }
  0x8d   :  { %4251 = vmatprep.mubr.msk.f32.mxu0 %vm109_vm1, %v3995_v32  ;;  %v78_v34 = vpop.permute.xlu0 %77  ;;  %v81_v35 = vpop.permute.xlu1 %80 }
  0x8e   :  { %vm88_vm8 = vcmp.eq.s32.totalorder %v78_v34, %v57_v21  ;;  %vm89_vm9 = vcmp.eq.s32.totalorder %v81_v35, %v57_v21 }
  0x8f   :  { %v3997_v36 = vsel %vm88_vm8, 1.0, %v4701_v13  ;;  %v3998_v37 = vsel %vm89_vm9, 1.0, %v4701_v13 }
  0x90   :  { %4252 = vmatmul.mubr.msk.f32.gmra.mrb[4].mxu0 %vm109_vm1, %v3996_v33 }
  0x91   :  { %4254 = vmatprep.mubr.msk.f32.mxu0 %vm109_vm1, %v3997_v36 }
  0x94   :  { %4255 = vmatmul.mubr.msk.f32.gmra.mrb[6].mxu0 %vm109_vm1, %v3998_v37  ;;  %vm3965_vm1 = vcmask 1043459  }
  0x95   :  { %4279 = vmatprep.mubr.msk.f32.mxu0 %vm4702_vm11, %v4701_v13 }
 0x15b   :  { %v4847_v38 = vpop.f32.mrb[0].mxu0 }
 0x15c   :  { %v4849_v39 = vpop.f32.mrb[1].mxu0 }
 0x15d   :  { %4265 = vmatprep.mubr.msk.f32.mxu1 %vm254_vm10, %v4849_v39 }
 0x15e   :  { %4266 = vmatmul.mubr.msk.f32.vlgmr.msra.gmra.mrb[0].mxu1 %vm254_vm10, %v4847_v38 }
 0x15f   :  { %v4855_v40 = vpop.f32.mrb[2].mxu0 }
 0x160   :  { %v4857_v41 = vpop.f32.mrb[3].mxu0 }
 0x161   :  { %4268 = vmatprep.mubr.msk.f32.mxu1 %vm254_vm10, %v4857_v41 }
 0x162   :  { %4269 = vmatmul.mubr.msk.f32.gmra.mrb[2].mxu1 %vm254_vm10, %v4855_v40 }
 0x163   :  { %v4863_v42 = vpop.f32.mrb[4].mxu0 }
 0x164   :  { %v4865_v43 = vpop.f32.mrb[5].mxu0 }
 0x165   :  { %4271 = vmatprep.mubr.msk.f32.mxu1 %vm254_vm10, %v4865_v43 }
 0x166   :  { %4272 = vmatmul.mubr.msk.f32.gmra.mrb[4].mxu1 %vm254_vm10, %v4863_v42 }
 0x167   :  { %v4871_v44 = vpop.f32.mrb[6].mxu0 }
 0x168   :  { %v4873_v45 = vpop.f32.mrb[7].mxu0 }
 0x169   :  { %4274 = vmatprep.mubr.msk.f32.mxu1 %vm254_vm10, %v4873_v45 }
 0x16a   :  { %4275 = vmatmul.mubr.msk.f32.gmra.mrb[6].mxu1 %vm254_vm10, %v4871_v44 }
 0x16b   :  { %4294 = vmatprep.mubr.msk.f32.mxu1 %vm4702_vm11, %v4701_v13 }
 0x231   :  { %v4267_v47 = vpop.f32.mrb[0].mxu1 }
 0x232   :  { %v4886_v48 = vadd.f32 %v4267_v47, %v4008_v46  ;;  %v345_v49 = vpop.f32.mrb[1].mxu1 }
 0x233   :  { %v4888_v50 = vadd.f32 %v4008_v46, %v345_v49 }
 0x234   :  { %467 = vrot.lane.b32.xlu1 %v4886_v48, %s4703_s26 }
 0x235   :  { %389 = vrot.lane.b32.xlu0 %v4888_v50, %s4703_s26  ;;  %v4270_v51 = vpop.f32.mrb[2].mxu1 }
 0x236   :  { %v4892_v52 = vadd.f32 %v4270_v51, %v4008_v46  ;;  %v355_v53 = vpop.f32.mrb[3].mxu1 }
 0x237   :  { %v4894_v54 = vadd.f32 %v4008_v46, %v355_v53 }
 0x238   :  { %621 = vrot.lane.b32.xlu1 %v4892_v52, %s4703_s26 }
 0x239   :  { %544 = vrot.lane.b32.xlu0 %v4894_v54, %s4703_s26  ;;  %v4273_v55 = vpop.f32.mrb[4].mxu1 }
 0x23a   :  { %v4898_v56 = vadd.f32 %v4273_v55, %v4008_v46  ;;  %v365_v57 = vpop.f32.mrb[5].mxu1 }
 0x23b   :  { %v4900_v58 = vadd.f32 %v4008_v46, %v365_v57 }
 0x23c   :  { %775 = vrot.lane.b32.xlu1 %v4898_v56, %s4703_s26 }
 0x23d   :  { %698 = vrot.lane.b32.xlu0 %v4900_v58, %s4703_s26  ;;  %v4276_v59 = vpop.f32.mrb[6].mxu1 }
 0x23e   :  { %v4904_v60 = vadd.f32 %v4276_v59, %v4008_v46  ;;  %v375_v61 = vpop.f32.mrb[7].mxu1 }
 0x23f   :  { %v4906_v62 = vadd.f32 %v4008_v46, %v375_v61 }
 0x240   :  { %929 = vrot.lane.b32.xlu1 %v4904_v60, %s4703_s26 }
 0x241   :  { %852 = vrot.lane.b32.xlu0 %v4906_v62, %s4703_s26 }
 0x244   :  { %1102 = vrot.lane.b32.xlu1 %v4888_v50, %s4704_s3 }
 0x245   :  { %1178 = vrot.lane.b32.xlu0 %v4886_v48, %s4704_s3 }
 0x248   :  { %1254 = vrot.lane.b32.xlu1 %v4894_v54, %s4704_s3 }
 0x249   :  { %1406 = vrot.lane.b32.xlu0 %v4900_v58, %s4704_s3 }
 0x24c   :  { %1330 = vrot.lane.b32.xlu1 %v4892_v52, %s4704_s3 }
 0x24d   :  { %1712 = vrot.lane.b32.xlu0 %v4888_v50, %s4705_s27 }
 0x250   :  { %1482 = vrot.lane.b32.xlu1 %v4898_v56, %s4704_s3 }
 0x251   :  { %1710 = vrot.lane.b32.xlu0 %v4888_v50, %s4706_s28 }
 0x254   :  { %1634 = vrot.lane.b32.xlu1 %v4904_v60, %s4704_s3 }
 0x255   :  { %1558 = vrot.lane.b32.xlu0 %v4906_v62, %s4704_s3 }
 0x258   :  { %1790 = vrot.lane.b32.xlu1 %v4886_v48, %s4705_s27 }
 0x25c   :  { %1788 = vrot.lane.b32.xlu1 %v4886_v48, %s4706_s28 }
 0x2a6   :  { %v468_v63 = vpop.permute.xlu1 %467 }
 0x2a7   :  { %v390_v0 = vpop.permute.xlu0 %389 }
 0x2a8   :  { %4278 = vmatpush3.xpose.msk.msra.mxu0 %vm391_vm12, %v390_v0 }
 0x2a9   :  { %4282 = vmatprep.subr.mxu0 %v4701_v13 }
 0x2aa   :  { %v622_v1 = vpop.permute.xlu1 %621 }
 0x2ab   :  { %4280 = vmatmul.mubr.msk.f32.vlgmr.msra.gmra.mrb[8].mxu0 %vm391_vm12, %v4888_v50  ;;  %4293 = vmatpush3.xpose.msk.msra.mxu1 %vm391_vm12, %v622_v1  ;;  %v545_v2 = vpop.permute.xlu0 %544 }
 0x2ac   :  { %4283 = vmatpush3.xpose.msk.msra.mxu0 %vm391_vm12, %v468_v63  ;;  %4302 = vmatprep.subr.mxu1 %v4701_v13 }
 0x2ad   :  { %4284 = vmatprep.mubr.msk.f32.mxu0 %vm4702_vm11, %v4701_v13  ;;  %4287 = vmatprep.subr.mxu0 %v4701_v13 }
 0x2ae   :  { %v776_v3 = vpop.permute.xlu1 %775  ;;  %4295 = vmatmul.mubr.msk.f32.vlgmr.msra.gmra.mrb[8].mxu1 %vm391_vm12, %v4892_v52 }
 0x2af   :  { %4285 = vmatmul.mubr.msk.f32.vlgmr.msra.gmra.mrb[10].mxu0 %vm391_vm12, %v4886_v48  ;;  %4303 = vmatpush3.xpose.msk.msra.mxu1 %vm391_vm12, %v776_v3  ;;  %v699_v4 = vpop.permute.xlu0 %698 }
 0x2b0   :  { %4288 = vmatpush3.xpose.msk.msra.mxu0 %vm391_vm12, %v545_v2  ;;  %4304 = vmatprep.mubr.msk.f32.mxu1 %vm4702_vm11, %v4701_v13 }
 0x2b1   :  { %4312 = vmatprep.subr.mxu1 %v4701_v13  ;;  %4289 = vmatprep.mubr.msk.f32.mxu0 %vm4702_vm11, %v4701_v13 }
 0x2b2   :  { %4305 = vmatmul.mubr.msk.f32.vlgmr.msra.gmra.mrb[10].mxu1 %vm391_vm12, %v4898_v56  ;;  %v930_v5 = vpop.permute.xlu1 %929  ;;  %4297 = vmatprep.subr.mxu0 %v4701_v13 }
 0x2b3   :  { %4290 = vmatmul.mubr.msk.f32.vlgmr.msra.gmra.mrb[12].mxu0 %vm391_vm12, %v4894_v54  ;;  %4313 = vmatpush3.xpose.msk.msra.mxu1 %vm391_vm12, %v930_v5  ;;  %v853_v6 = vpop.permute.xlu0 %852 }
 0x2b4   :  { %4298 = vmatpush3.xpose.msk.msra.mxu0 %vm391_vm12, %v699_v4  ;;  %4314 = vmatprep.mubr.msk.f32.mxu1 %vm4702_vm11, %v4701_v13 }
 0x2b5   :  { %4299 = vmatprep.mubr.msk.f32.mxu0 %vm4702_vm11, %v4701_v13  ;;  %4307 = vmatprep.subr.mxu0 %v4701_v13 }
 0x2b6   :  { %4315 = vmatmul.mubr.msk.f32.vlgmr.msra.gmra.mrb[12].mxu1 %vm391_vm12, %v4904_v60  ;;  %4322 = vmatprep.subr.mxu1 %v4701_v13  ;;  %v1103_v8 = vpop.permute.xlu1 %1102 }
 0x2b7   :  { %4300 = vmatmul.mubr.msk.f32.vlgmr.msra.gmra.mrb[14].mxu0 %vm391_vm12, %v4900_v58  ;;  %v1179_v7 = vpop.permute.xlu0 %1178  ;;  %4324 = vmatprep.mubr.msk.f32.mxu1 %vm4702_vm11, %v4701_v13 }
 0x2b8   :  { %4308 = vmatpush3.xpose.msk.msra.mxu0 %vm391_vm12, %v853_v6  ;;  %4323 = vmatpush3.msra.mxu1 %v1179_v7 }
 0x2b9   :  { %4309 = vmatprep.mubr.msk.f32.mxu0 %vm4702_vm11, %v4701_v13  ;;  %4317 = vmatprep.subr.mxu0 %v4701_v13 }
 0x2ba   :  { %4332 = vmatprep.subr.mxu1 %v4701_v13  ;;  %v4994_v53 = vpop.permute.xlu1 %1254 }
 0x2bb   :  { %4310 = vmatmul.mubr.msk.f32.vlgmr.msra.gmra.mrb[16].mxu0 %vm391_vm12, %v4906_v62  ;;  %v4998_v57 = vpop.permute.xlu0 %1406 }
 0x2bc   :  { %4318 = vmatpush3.msra.mxu0 %v1103_v8  ;;  %4319 = vmatprep.mubr.msk.f32.mxu0 %vm4702_vm11, %v4701_v13 }
 0x2bd   :  { %4327 = vmatprep.subr.mxu0 %v4701_v13 }
 0x2be   :  { %v4996_v55 = vpop.permute.xlu1 %1330 }
 0x2bf   :  { %v5002_v61 = vpop.permute.xlu0 %1712 }
 0x2c2   :  { %v5000_v59 = vpop.permute.xlu1 %1482 }
 0x2c3   :  { %v5006_v0 = vpop.permute.xlu0 %1710 }
 0x2c6   :  { %v5004_v63 = vpop.permute.xlu1 %1634 }
 0x2c7   :  { %v5010_v2 = vpop.permute.xlu0 %1558 }
 0x2ca   :  { %v5008_v1 = vpop.permute.xlu1 %1790 }
 0x2ce   :  { %v5012_v3 = vpop.permute.xlu1 %1788 }
 0x37e   :  { %v462_v9 = vpop.f32.mrb[8].mxu0 }
 0x37f   :  { %v1005_v10 = vmul.f32 0.25, %v462_v9  ;;  %v4281_v11 = vpop.f32.mrb[9].mxu0 }
 0x381   :  { %v693_v12 = vpop.f32.mrb[8].mxu1  ;;  %v1014_v14 = vsel %vm1013_vm13, %v1005_v10, -inf }
 0x382   :  { %v1008_v15 = vmul.f32 0.25, %v693_v12  ;;  %v4296_v16 = vpop.f32.mrb[9].mxu1  ;;  %1015 = vmax.xlane.f32.xlu0 %v1014_v14  ;;  %v539_v17 = vpop.f32.mrb[10].mxu0 }
 0x383   :  { %v1006_v18 = vmul.f32 0.25, %v539_v17  ;;  %v4286_v19 = vpop.f32.mrb[11].mxu0 }
 0x384   :  { %v1023_v20 = vsel %vm1013_vm13, %v1008_v15, -inf }
 0x385   :  { %v847_v21 = vpop.f32.mrb[10].mxu1  ;;  %v1017_v22 = vsel %vm1013_vm13, %v1006_v18, -inf }
 0x386   :  { %v1010_v23 = vmul.f32 0.25, %v847_v21  ;;  %v4306_v24 = vpop.f32.mrb[11].mxu1  ;;  %1024 = vmax.xlane.f32.xlu0 %v1023_v20  ;;  %1018 = vmax.xlane.f32.xlu1 %v1017_v22  ;;  %v616_v25 = vpop.f32.mrb[12].mxu0 }
 0x387   :  { %v4291_v26 = vpop.f32.mrb[13].mxu0  ;;  %v1007_v28 = vmul.f32 0.25, %v616_v25 }
 0x388   :  { %v1029_v27 = vsel %vm1013_vm13, %v1010_v23, -inf }
 0x389   :  { %v1001_v29 = vpop.f32.mrb[12].mxu1  ;;  %v1020_v34 = vsel %vm1013_vm13, %v1007_v28, -inf }
 0x38a   :  { %v4316_v30 = vpop.f32.mrb[13].mxu1  ;;  %1030 = vmax.xlane.f32.xlu0 %v1029_v27  ;;  %v770_v31 = vpop.f32.mrb[14].mxu0  ;;  %v4980_v33 = vmul.f32 0.25, %v1001_v29 }
 0x38b   :  { %v4301_v32 = vpop.f32.mrb[15].mxu0  ;;  %v1009_v46 = vmul.f32 0.25, %v770_v31 }
 0x38c   :  { %v1035_v37 = vsel %vm1013_vm13, %v4980_v33, -inf }
 0x38d   :  { %v1026_v49 = vsel %vm1013_vm13, %v1009_v46, -inf }
 0x38e   :  { %1021 = vmax.xlane.f32.xlu0 %v1020_v34  ;;  %v924_v35 = vpop.f32.mrb[16].mxu0 }
 0x38f   :  { %v4311_v36 = vpop.f32.mrb[17].mxu0  ;;  %v4989_v47 = vmul.f32 0.25, %v924_v35 }
 0x391   :  { %v1032_v51 = vsel %vm1013_vm13, %v4989_v47, -inf }
 0x392   :  { %1036 = vmax.xlane.f32.xlu0 %v1035_v37 }
 0x397   :  { %1946 = vrot.lane.b32.xlu1 %v4892_v52, %s4705_s27 }
 0x3a8   :  { %1868 = vrot.lane.b32.xlu0 %v4894_v54, %s4705_s27 }
 0x3bb   :  { %1027 = vmax.xlane.f32.xlu1 %v1026_v49 }
 0x3bf   :  { %1033 = vmax.xlane.f32.xlu1 %v1032_v51 }
 0x40f   :  { %v1016_v4 = vpop.xlane.xlu0 %1015 }
 0x410   :  { %v1038_v5 = vsub.f32 %v1005_v10, %v1016_v4 }
 0x412   :  { %v1046_v6 = vmul.f32 1.442695, %v1038_v5 }
 0x413   :  { %v1019_v7 = vpop.xlane.xlu1 %1018  ;;  %v1025_v8 = vpop.xlane.xlu0 %1024 }
 0x414   :  { %4580 = vpow2.f32 %v1046_v6  ;;  %v1039_v9 = vsub.f32 %v1006_v18, %v1019_v7  ;;  %v1041_v11 = vsub.f32 %v1008_v15, %v1025_v8 }
 0x416   :  { %v1052_v12 = vmul.f32 1.442695, %v1041_v11  ;;  %v1048_v14 = vmul.f32 1.442695, %v1039_v9 }
 0x417   :  { %v1031_v16 = vpop.xlane.xlu0 %1030  ;;  %v5028_v29 = vpop.permute.xlu1 %1946 }
 0x418   :  { %v1043_v17 = vsub.f32 %v1010_v23, %v1031_v16  ;;  %4582 = vpow2.f32 %v1052_v12 }
 0x419   :  { %4584 = vpow2.f32 %v1048_v14 }
 0x41a   :  { %v1056_v19 = vmul.f32 1.442695, %v1043_v17 }
 0x41b   :  { %v1022_v25 = vpop.xlane.xlu0 %1021 }
 0x41c   :  { %4586 = vpow2.f32 %v1056_v19  ;;  %v1040_v26 = vsub.f32 %v1007_v28, %v1022_v25 }
 0x41e   :  { %v4581_v20 = vpop.eup %4580  ;;  %v1050_v27 = vmul.f32 1.442695, %v1040_v26 }
 0x41f   :  { %v1062_v21 = vsel %vm1013_vm13, %v4581_v20, 0.0  ;;  %v1037_v31 = vpop.xlane.xlu0 %1036 }
 0x420   :  { %1063 = vadd.xlane.f32.xlu1 %v1062_v21  ;;  %4588 = vpow2.f32 %v1050_v27  ;;  %v1045_v35 = vsub.f32 %v4980_v33, %v1037_v31 }
 0x422   :  { %v5015_v22 = vpop.eup %4582  ;;  %v1060_v36 = vmul.f32 1.442695, %v1045_v35 }
 0x423   :  { %v1071_v10 = vsel %vm1013_vm13, %v5015_v22, 0.0  ;;  %v4585_v24 = vpop.eup %4584  ;;  %v5064_v9 = vpop.permute.xlu0 %1868 }
 0x424   :  { %1072 = vadd.xlane.f32.xlu0 %v1071_v10  ;;  %v1065_v15 = vsel %vm1013_vm13, %v4585_v24, 0.0 }
 0x426   :  { %v5020_v18 = vpop.eup %4586 }
 0x427   :  { %v1077_v23 = vsel %vm1013_vm13, %v5020_v18, 0.0 }
 0x428   :  { %1066 = vadd.xlane.f32.xlu0 %v1065_v15 }
 0x42a   :  { %v5031_v37 = vpop.eup %4588 }
 0x42b   :  { %v1068_v28 = vsel %vm1013_vm13, %v5031_v37, 0.0 }
 0x42c   :  { %1078 = vadd.xlane.f32.xlu0 %v1077_v23 }
 0x431   :  { %1944 = vrot.lane.b32.xlu1 %v4892_v52, %s4706_s28 }
 0x442   :  { %1866 = vrot.lane.b32.xlu0 %v4894_v54, %s4706_s28 }
 0x448   :  { %v1028_v30 = vpop.xlane.xlu1 %1027 }
 0x449   :  { %v1042_v32 = vsub.f32 %v1009_v46, %v1028_v30 }
 0x44b   :  { %v1054_v34 = vmul.f32 1.442695, %v1042_v32 }
 0x44c   :  { %v1034_v46 = vpop.xlane.xlu1 %1033 }
 0x44d   :  { %4590 = vpow2.f32 %v1054_v34  ;;  %v1044_v5 = vsub.f32 %v4989_v47, %v1034_v46 }
 0x44e   :  { %4592 = vpow2.f32 %v1060_v36 }
 0x44f   :  { %v1058_v6 = vmul.f32 1.442695, %v1044_v5 }
 0x451   :  { %4594 = vpow2.f32 %v1058_v6 }
 0x455   :  { %1069 = vadd.xlane.f32.xlu1 %v1068_v28 }
 0x457   :  { %v5035_v49 = vpop.eup %4590 }
 0x458   :  { %v1074_v51 = vsel %vm1013_vm13, %v5035_v49, 0.0  ;;  %v5039_v4 = vpop.eup %4592 }
 0x459   :  { %1075 = vadd.xlane.f32.xlu1 %v1074_v51  ;;  %v1083_v33 = vsel %vm1013_vm13, %v5039_v4, 0.0 }
 0x45b   :  { %v5054_v7 = vpop.eup %4594 }
 0x45c   :  { %v1080_v8 = vsel %vm1013_vm13, %v5054_v7, 0.0 }
 0x461   :  { %1084 = vadd.xlane.f32.xlu0 %v1083_v33 }
 0x46a   :  { %2102 = vrot.lane.b32.xlu1 %v4898_v56, %s4705_s27 }
 0x477   :  { %2024 = vrot.lane.b32.xlu0 %v4900_v58, %s4705_s27 }
 0x47b   :  { %2022 = vrot.lane.b32.xlu0 %v4900_v58, %s4706_s28 }
 0x47f   :  { %2180 = vrot.lane.b32.xlu0 %v4906_v62, %s4705_s27 }
 0x483   :  { %2178 = vrot.lane.b32.xlu0 %v4906_v62, %s4706_s28 }
 0x48e   :  { %1081 = vadd.xlane.f32.xlu1 %v1080_v8 }
 0x49f   :  { %2100 = vrot.lane.b32.xlu1 %v4898_v56, %s4706_s28 }
 0x4a3   :  { %2258 = vrot.lane.b32.xlu1 %v4904_v60, %s4705_s27 }
 0x4a7   :  { %2256 = vrot.lane.b32.xlu1 %v4904_v60, %s4706_s28 }
 0x4ad   :  { %v1064_v47 = vpop.xlane.xlu1 %1063 }
 0x4ae   :  { %4596 = vrcp.f32 %v1064_v47 }
 0x4b1   :  { %v1073_v11 = vpop.xlane.xlu0 %1072 }
 0x4b5   :  { %v1067_v12 = vpop.xlane.xlu0 %1066 }
 0x4b6   :  { %4598 = vrcp.f32 %v1067_v12 }
 0x4b7   :  { %4600 = vrcp.f32 %v1073_v11 }
 0x4b8   :  { %v4597_v14 = vpop.eup %4596 }
 0x4b9   :  { %v1094_v16 = vmul.f32 %v4597_v14, %v4581_v20  ;;  %v1079_v17 = vpop.xlane.xlu0 %1078 }
 0x4ba   :  { %4602 = vrcp.f32 %v1079_v17 }
 0x4bb   :  { %4320 = vmatmul.mubr.msk.f32.vlgmr.msra.gmra.mrb[18].mxu0 %vm1013_vm13, %v1094_v16 }
 0x4bc   :  { %4328 = vmatpush3.msra.mxu0 %v4994_v53  ;;  %4329 = vmatprep.mubr.msk.f32.mxu0 %vm4702_vm11, %v4701_v13 }
 0x4bd   :  { %4337 = vmatprep.subr.mxu0 %v4701_v13  ;;  %v1867_v15 = vpop.permute.xlu0 %1866 }
 0x4c0   :  { %v4599_v19 = vpop.eup %4598 }
 0x4c1   :  { %v1095_v21 = vmul.f32 %v4599_v19, %v4585_v24  ;;  %v4601_v10 = vpop.eup %4600 }
 0x4c2   :  { %v1097_v20 = vmul.f32 %v4601_v10, %v5015_v22 }
 0x4c3   :  { %4325 = vmatmul.mubr.msk.f32.vlgmr.msra.gmra.mrb[14].mxu1 %vm1013_vm13, %v1095_v21 }
 0x4c4   :  { %4333 = vmatpush3.msra.mxu1 %v4996_v55  ;;  %4334 = vmatprep.mubr.msk.f32.mxu1 %vm4702_vm11, %v4701_v13  ;;  %v4603_v53 = vpop.eup %4602  ;;  %v1945_v55 = vpop.permute.xlu1 %1944 }
 0x4c5   :  { %4342 = vmatprep.subr.mxu1 %v4701_v13  ;;  %v1099_v24 = vmul.f32 %v4603_v53, %v5020_v18 }
 0x4c7   :  { %4335 = vmatmul.mubr.msk.f32.vlgmr.msra.gmra.mrb[16].mxu1 %vm1013_vm13, %v1097_v20 }
 0x4c8   :  { %4343 = vmatpush3.msra.mxu1 %v5000_v59  ;;  %4344 = vmatprep.mubr.msk.f32.mxu1 %vm4702_vm11, %v4701_v13 }
 0x4c9   :  { %4352 = vmatprep.subr.mxu1 %v4701_v13 }
 0x4cb   :  { %4345 = vmatmul.mubr.msk.f32.vlgmr.msra.gmra.mrb[18].mxu1 %vm1013_vm13, %v1099_v24 }
 0x4cc   :  { %4353 = vmatpush3.msra.mxu1 %v5004_v63  ;;  %4354 = vmatprep.mubr.msk.f32.mxu1 %vm4702_vm11, %v4701_v13 }
 0x4cd   :  { %4362 = vmatprep.subr.mxu1 %v4701_v13 }
 0x4e2   :  { %v1070_v22 = vpop.xlane.xlu1 %1069 }
 0x4e3   :  { %4604 = vrcp.f32 %v1070_v22 }
 0x4e6   :  { %v1076_v59 = vpop.xlane.xlu1 %1075 }
 0x4e7   :  { %4606 = vrcp.f32 %v1076_v59 }
 0x4ed   :  { %v4605_v23 = vpop.eup %4604 }
 0x4ee   :  { %v1096_v18 = vmul.f32 %v4605_v23, %v5031_v37  ;;  %v1085_v25 = vpop.xlane.xlu0 %1084 }
 0x4ef   :  { %4608 = vrcp.f32 %v1085_v25 }
 0x4f0   :  { %4330 = vmatmul.mubr.msk.f32.vlgmr.msra.gmra.mrb[20].mxu0 %vm1013_vm13, %v1096_v18 }
 0x4f1   :  { %v4607_v26 = vpop.eup %4606  ;;  %4338 = vmatpush3.msra.mxu0 %v4998_v57  ;;  %4339 = vmatprep.mubr.msk.f32.mxu0 %vm4702_vm11, %v4701_v13  ;;  %v2103_v57 = vpop.permute.xlu1 %2102 }
 0x4f2   :  { %v1098_v63 = vmul.f32 %v4607_v26, %v5035_v49  ;;  %4347 = vmatprep.subr.mxu0 %v4701_v13  ;;  %v2025_v31 = vpop.permute.xlu0 %2024 }
 0x4f4   :  { %4340 = vmatmul.mubr.msk.f32.vlgmr.msra.gmra.mrb[22].mxu0 %vm1013_vm13, %v1098_v63 }
 0x4f5   :  { %4348 = vmatpush3.msra.mxu0 %v5010_v2  ;;  %4349 = vmatprep.mubr.msk.f32.mxu0 %vm4702_vm11, %v4701_v13 }
 0x4f6   :  { %4357 = vmatprep.subr.mxu0 %v4701_v13  ;;  %v2023_v35 = vpop.permute.xlu0 %2022 }
 0x4f9   :  { %v4609_v27 = vpop.eup %4608 }
 0x4fa   :  { %v1101_v30 = vmul.f32 %v4609_v27, %v5039_v4 }
 0x4fc   :  { %4355 = vmatmul.mubr.msk.f32.vlgmr.msra.gmra.mrb[20].mxu1 %vm1013_vm13, %v1101_v30 }
 0x4fd   :  { %4363 = vmatpush3.xpose.msk.msra.mxu1 %vm391_vm12, %v5008_v1  ;;  %4364 = vmatprep.mubr.msk.f32.mxu1 %vm4702_vm11, %v4701_v13 }
 0x4fe   :  { %4372 = vmatprep.subr.mxu1 %v4701_v13 }
 0x500   :  { %4365 = vmatmul.mubr.msk.f32.vlgmr.msra.gmra.mrb[22].mxu1 %vm391_vm12, %v5012_v3 }
 0x501   :  { %4373 = vmatpush3.xpose.msk.msra.mxu1 %vm391_vm12, %v5028_v29  ;;  %4374 = vmatprep.mubr.msk.f32.mxu1 %vm4702_vm11, %v4701_v13 }
 0x502   :  { %4382 = vmatprep.subr.mxu1 %v4701_v13 }
 0x504   :  { %4375 = vmatmul.mubr.msk.f32.vlgmr.msra.gmra.mrb[24].mxu1 %vm391_vm12, %v1945_v55 }
 0x505   :  { %4383 = vmatpush3.xpose.msk.msra.mxu1 %vm391_vm12, %v2103_v57  ;;  %4384 = vmatprep.mubr.msk.f32.mxu1 %vm4702_vm11, %v4701_v13 }
 0x506   :  { %4392 = vmatprep.subr.mxu1 %v4701_v13 }
 0x51b   :  { %v1082_v1 = vpop.xlane.xlu1 %1081 }
 0x51c   :  { %4610 = vrcp.f32 %v1082_v1 }
 0x51f   :  { %v2101_v2 = vpop.permute.xlu1 %2100 }
 0x520   :  { %4385 = vmatmul.mubr.msk.f32.vlgmr.msra.gmra.mrb[26].mxu1 %vm391_vm12, %v2101_v2 }
 0x521   :  { %4394 = vmatprep.mubr.msk.f32.mxu1 %vm4702_vm11, %v4701_v13 }
 0x523   :  { %v2259_v3 = vpop.permute.xlu1 %2258 }
 0x524   :  { %4393 = vmatpush3.xpose.msk.msra.mxu1 %vm391_vm12, %v2259_v3 }
 0x525   :  { %4402 = vmatprep.subr.mxu1 %v4701_v13 }
 0x526   :  { %v4611_v29 = vpop.eup %4610 }
 0x527   :  { %v1100_v32 = vmul.f32 %v4611_v29, %v5054_v7  ;;  %v2257_v34 = vpop.permute.xlu1 %2256 }
 0x528   :  { %4395 = vmatmul.mubr.msk.f32.vlgmr.msra.gmra.mrb[28].mxu1 %vm391_vm12, %v2257_v34 }
 0x529   :  { %4350 = vmatmul.mubr.msk.f32.vlgmr.msra.gmra.mrb[24].mxu0 %vm1013_vm13, %v1100_v32  ;;  %4404 = vmatprep.mubr.msk.f32.mxu1 %vm4702_vm11, %v4701_v13 }
 0x52a   :  { %4358 = vmatpush3.xpose.msk.msra.mxu0 %vm391_vm12, %v5002_v61  ;;  %4359 = vmatprep.mubr.msk.f32.mxu0 %vm4702_vm11, %v4701_v13  ;;  %v2181_v61 = vpop.permute.xlu0 %2180 }
 0x52b   :  { %4367 = vmatprep.subr.mxu0 %v4701_v13 }
 0x52d   :  { %4360 = vmatmul.mubr.msk.f32.vlgmr.msra.gmra.mrb[26].mxu0 %vm391_vm12, %v5006_v0 }
 0x52e   :  { %4368 = vmatpush3.xpose.msk.msra.mxu0 %vm391_vm12, %v5064_v9  ;;  %4369 = vmatprep.mubr.msk.f32.mxu0 %vm4702_vm11, %v4701_v13  ;;  %v2179_v0 = vpop.permute.xlu0 %2178 }
 0x52f   :  { %4377 = vmatprep.subr.mxu0 %v4701_v13 }
 0x531   :  { %4370 = vmatmul.mubr.msk.f32.vlgmr.msra.gmra.mrb[28].mxu0 %vm391_vm12, %v1867_v15 }
 0x532   :  { %4378 = vmatpush3.xpose.msk.msra.mxu0 %vm391_vm12, %v2025_v31  ;;  %4379 = vmatprep.mubr.msk.f32.mxu0 %vm4702_vm11, %v4701_v13 }
 0x533   :  { %4387 = vmatprep.subr.mxu0 %v4701_v13 }
 0x535   :  { %4380 = vmatmul.mubr.msk.f32.vlgmr.msra.gmra.mrb[30].mxu0 %vm391_vm12, %v2023_v35 }
 0x536   :  { %4388 = vmatpush3.xpose.msk.msra.mxu0 %vm391_vm12, %v2181_v61  ;;  %4389 = vmatprep.mubr.msk.f32.mxu0 %vm4702_vm11, %v4701_v13 }
 0x537   :  { %4397 = vmatprep.subr.mxu0 %v4701_v13 }
 0x539   :  { %4390 = vmatmul.mubr.msk.f32.vlgmr.msra.gmra.mrb[32].mxu0 %vm391_vm12, %v2179_v0 }
 0x53a   :  { %4399 = vmatprep.mubr.msk.f32.mxu0 %vm4702_vm11, %v4701_v13 }
 0x58e   :  { %v5154_v36 = vpop.f32.mrb[18].mxu0 }
 0x58f   :  { %v4321_v37 = vpop.f32.mrb[19].mxu0 }
 0x596   :  { %v5156_v28 = vpop.f32.mrb[14].mxu1 }
 0x597   :  { %v4326_v49 = vpop.f32.mrb[15].mxu1 }
 0x59a   :  { %v5158_v51 = vpop.f32.mrb[16].mxu1 }
 0x59b   :  { %v4336_v4 = vpop.f32.mrb[17].mxu1 }
 0x59e   :  { %v5160_v33 = vpop.f32.mrb[18].mxu1 }
 0x59f   :  { %v4346_v46 = vpop.f32.mrb[19].mxu1 }
 0x5c3   :  { %v5162_v5 = vpop.f32.mrb[20].mxu0 }
 0x5c4   :  { %v4331_v6 = vpop.f32.mrb[21].mxu0 }
 0x5c7   :  { %v5164_v7 = vpop.f32.mrb[22].mxu0 }
 0x5c8   :  { %v4341_v8 = vpop.f32.mrb[23].mxu0 }
 0x5cf   :  { %v5166_v47 = vpop.f32.mrb[20].mxu1 }
 0x5d0   :  { %v4356_v9 = vpop.f32.mrb[21].mxu1 }
 0x5d3   :  { %v1862_v11 = vpop.f32.mrb[22].mxu1 }
 0x5d4   :  { %v2335_v12 = vmul.f32 0.25, %v1862_v11  ;;  %v4366_v14 = vpop.f32.mrb[23].mxu1 }
 0x5d6   :  { %v2345_v16 = vsel %vm1013_vm13, %v2335_v12, -inf }
 0x5d7   :  { %2346 = vmax.xlane.f32.xlu1 %v2345_v16  ;;  %v2018_v17 = vpop.f32.mrb[24].mxu1 }
 0x5d8   :  { %v4376_v19 = vpop.f32.mrb[25].mxu1  ;;  %v2337_v63 = vmul.f32 0.25, %v2018_v17 }
 0x5da   :  { %v2351_v3 = vsel %vm1013_vm13, %v2337_v63, -inf }
 0x5f3   :  { %v2174_v21 = vpop.f32.mrb[26].mxu1 }
 0x5f4   :  { %v4386_v10 = vpop.f32.mrb[27].mxu1  ;;  %v2339_v2 = vmul.f32 0.25, %v2174_v21 }
 0x5f6   :  { %v2357_v61 = vsel %vm1013_vm13, %v2339_v2, -inf }
 0x5fb   :  { %v2330_v20 = vpop.f32.mrb[28].mxu1 }
 0x5fc   :  { %v5169_v53 = vpop.f32.mrb[24].mxu0  ;;  %v4396_v24 = vpop.f32.mrb[29].mxu1  ;;  %v2341_v35 = vmul.f32 0.25, %v2330_v20 }
 0x5fd   :  { %v4351_v55 = vpop.f32.mrb[25].mxu0 }
 0x5fe   :  { %v2363_v37 = vsel %vm1013_vm13, %v2341_v35, -inf }
 0x600   :  { %v1784_v22 = vpop.f32.mrb[26].mxu0 }
 0x601   :  { %v2334_v59 = vmul.f32 0.25, %v1784_v22  ;;  %v4361_v15 = vpop.f32.mrb[27].mxu0 }
 0x603   :  { %v2342_v23 = vsel %vm1013_vm13, %v2334_v59, -inf }
 0x604   :  { %2343 = vmax.xlane.f32.xlu0 %v2342_v23  ;;  %v1940_v18 = vpop.f32.mrb[28].mxu0 }
 0x605   :  { %v2336_v25 = vmul.f32 0.25, %v1940_v18  ;;  %v4371_v26 = vpop.f32.mrb[29].mxu0 }
 0x607   :  { %v2348_v27 = vsel %vm1013_vm13, %v2336_v25, -inf }
 0x608   :  { %2349 = vmax.xlane.f32.xlu0 %v2348_v27  ;;  %v2096_v30 = vpop.f32.mrb[30].mxu0 }
 0x609   :  { %v2338_v57 = vmul.f32 0.25, %v2096_v30  ;;  %v4381_v1 = vpop.f32.mrb[31].mxu0 }
 0x60b   :  { %v2354_v29 = vsel %vm1013_vm13, %v2338_v57, -inf }
 0x60c   :  { %2352 = vmax.xlane.f32.xlu0 %v2351_v3  ;;  %2355 = vmax.xlane.f32.xlu1 %v2354_v29  ;;  %v2252_v31 = vpop.f32.mrb[32].mxu0 }
 0x60d   :  { %v2340_v32 = vmul.f32 0.25, %v2252_v31  ;;  %v4391_v34 = vpop.f32.mrb[33].mxu0 }
 0x60f   :  { %v2360_v0 = vsel %vm1013_vm13, %v2340_v32, -inf }
 0x610   :  { %2358 = vmax.xlane.f32.xlu0 %v2357_v61  ;;  %2361 = vmax.xlane.f32.xlu1 %v2360_v0 }
 0x614   :  { %2364 = vmax.xlane.f32.xlu0 %v2363_v37 }
 0x621   :  { %2430 = vrot.lane.b32.xlu1 %v4888_v50, %s4707_s29 }
 0x625   :  { %2582 = vrot.lane.b32.xlu1 %v4894_v54, %s4707_s29 }
 0x629   :  { %2658 = vrot.lane.b32.xlu1 %v4892_v52, %s4707_s29 }
 0x62a   :  { %2506 = vrot.lane.b32.xlu0 %v4886_v48, %s4707_s29 }
 0x62d   :  { %2810 = vrot.lane.b32.xlu1 %v4898_v56, %s4707_s29 }
 0x62e   :  { %2734 = vrot.lane.b32.xlu0 %v4900_v58, %s4707_s29 }
 0x664   :  { %v2347_v49 = vpop.xlane.xlu1 %2346 }
 0x665   :  { %v2367_v4 = vsub.f32 %v2335_v12, %v2347_v49 }
 0x667   :  { %v2376_v46 = vmul.f32 1.442695, %v2367_v4 }
 0x669   :  { %4612 = vpow2.f32 %v2376_v46 }
 0x673   :  { %v5190_v50 = vpop.eup %4612 }
 0x674   :  { %v2393_v54 = vsel %vm1013_vm13, %v5190_v50, 0.0 }
 0x675   :  { %2394 = vadd.xlane.f32.xlu0 %v2393_v54 }
 0x691   :  { %v2344_v52 = vpop.xlane.xlu0 %2343 }
 0x692   :  { %v2366_v6 = vsub.f32 %v2334_v59, %v2344_v52 }
 0x694   :  { %v2374_v8 = vmul.f32 1.442695, %v2366_v6 }
 0x695   :  { %v2350_v48 = vpop.xlane.xlu0 %2349 }
 0x696   :  { %4614 = vpow2.f32 %v2374_v8  ;;  %v2368_v9 = vsub.f32 %v2336_v25, %v2350_v48 }
 0x698   :  { %v2378_v56 = vmul.f32 1.442695, %v2368_v9 }
 0x699   :  { %v2356_v11 = vpop.xlane.xlu1 %2355  ;;  %v2353_v14 = vpop.xlane.xlu0 %2352 }
 0x69a   :  { %4616 = vpow2.f32 %v2378_v56  ;;  %v2370_v58 = vsub.f32 %v2338_v57, %v2356_v11  ;;  %v2369_v12 = vsub.f32 %v2337_v63, %v2353_v14 }
 0x69c   :  { %v2382_v16 = vmul.f32 1.442695, %v2370_v58  ;;  %v2380_v17 = vmul.f32 1.442695, %v2369_v12 }
 0x69d   :  { %v2362_v19 = vpop.xlane.xlu1 %2361  ;;  %v2359_v21 = vpop.xlane.xlu0 %2358 }
 0x69e   :  { %4618 = vpow2.f32 %v2382_v16  ;;  %v2372_v10 = vsub.f32 %v2340_v32, %v2362_v19  ;;  %v2371_v20 = vsub.f32 %v2339_v2, %v2359_v21 }
 0x69f   :  { %4620 = vpow2.f32 %v2380_v17 }
 0x6a0   :  { %v4615_v24 = vpop.eup %4614  ;;  %v2386_v55 = vmul.f32 1.442695, %v2372_v10  ;;  %v2384_v22 = vmul.f32 1.442695, %v2371_v20 }
 0x6a1   :  { %v2431_v59 = vpop.permute.xlu1 %2430  ;;  %v2365_v15 = vpop.xlane.xlu0 %2364  ;;  %v2390_v23 = vsel %vm1013_vm13, %v4615_v24, 0.0 }
 0x6a2   :  { %4622 = vpow2.f32 %v2386_v55  ;;  %v2373_v18 = vsub.f32 %v2341_v35, %v2365_v15  ;;  %4398 = vmatpush3.msra.mxu0 %v2431_v59  ;;  %2391 = vadd.xlane.f32.xlu1 %v2390_v23  ;;  %v386_v15 = vld [vmem:[%s5522_s4 + $0x10] sm:$0xff]  ;;  %v387_v23 = vld [vmem:[%s5522_s4 + $0x18] sm:$0xff] }
 0x6a3   :  { %4624 = vpow2.f32 %v2384_v22  ;;  %4407 = vmatprep.subr.mxu0 %v4701_v13 }
 0x6a4   :  { %v4617_v25 = vpop.eup %4616  ;;  %v2388_v26 = vmul.f32 1.442695, %v2373_v18  ;;  %v4529_v18 = vpack.c.bf16 %v387_v23, %v386_v15 }
 0x6a5   :  { %v2507_v63 = vpop.permute.xlu0 %2506  ;;  %v2396_v27 = vsel %vm1013_vm13, %v4617_v25, 0.0  ;;  %v2583_v37 = vpop.permute.xlu1 %2582 }
 0x6a6   :  { %4626 = vpow2.f32 %v2388_v26  ;;  %2397 = vadd.xlane.f32.xlu1 %v2396_v27  ;;  %4403 = vmatpush3.msra.mxu1 %v2507_v63 }
 0x6a7   :  { %4412 = vmatprep.subr.mxu1 %v4701_v13 }
 0x6a8   :  { %v4619_v30 = vpop.eup %4618 }
 0x6a9   :  { %v4621_v57 = vpop.eup %4620  ;;  %v2402_v1 = vsel %vm1013_vm13, %v4619_v30, 0.0  ;;  %v2735_v61 = vpop.permute.xlu0 %2734 }
 0x6aa   :  { %2403 = vadd.xlane.f32.xlu1 %v2402_v1  ;;  %v2399_v2 = vsel %vm1013_vm13, %v4621_v57, 0.0  ;;  %v2659_v46 = vpop.permute.xlu1 %2658 }
 0x6ab   :  { %2400 = vadd.xlane.f32.xlu0 %v2399_v2 }
 0x6ac   :  { %v4623_v3 = vpop.eup %4622 }
 0x6ad   :  { %v4625_v29 = vpop.eup %4624  ;;  %v2408_v31 = vsel %vm1013_vm13, %v4623_v3, 0.0 }
 0x6ae   :  { %2409 = vadd.xlane.f32.xlu1 %v2408_v31  ;;  %v2405_v32 = vsel %vm1013_vm13, %v4625_v29, 0.0 }
 0x6af   :  { %2406 = vadd.xlane.f32.xlu0 %v2405_v32 }
 0x6b0   :  { %v5202_v34 = vpop.eup %4626 }
 0x6b1   :  { %v2411_v35 = vsel %vm1013_vm13, %v5202_v34, 0.0 }
 0x6b3   :  { %2412 = vadd.xlane.f32.xlu0 %v2411_v35 }
 0x6bf   :  { %2962 = vrot.lane.b32.xlu1 %v4904_v60, %s4707_s29  ;;  %v2811_v60 = vpop.permute.xlu1 %2810 }
 0x6c9   :  { %2886 = vrot.lane.b32.xlu0 %v4906_v62, %s4707_s29 }
 0x702   :  { %v2395_v0 = vpop.xlane.xlu0 %2394 }
 0x703   :  { %4628 = vrcp.f32 %v2395_v0 }
 0x70d   :  { %v4629_v49 = vpop.eup %4628 }
 0x70e   :  { %v2423_v4 = vmul.f32 %v4629_v49, %v5190_v50 }
 0x710   :  { %4405 = vmatmul.mubr.msk.f32.vlgmr.msra.gmra.mrb[30].mxu1 %vm1013_vm13, %v2423_v4 }
 0x711   :  { %4413 = vmatpush3.msra.mxu1 %v2659_v46  ;;  %4414 = vmatprep.mubr.msk.f32.mxu1 %vm4702_vm11, %v4701_v13 }
 0x712   :  { %4422 = vmatprep.subr.mxu1 %v4701_v13 }
 0x72f   :  { %v2392_v54 = vpop.xlane.xlu1 %2391 }
 0x730   :  { %4630 = vrcp.f32 %v2392_v54 }
 0x733   :  { %v2398_v62 = vpop.xlane.xlu1 %2397 }
 0x734   :  { %4632 = vrcp.f32 %v2398_v62 }
 0x737   :  { %v2404_v52 = vpop.xlane.xlu1 %2403 }
 0x738   :  { %4634 = vrcp.f32 %v2404_v52  ;;  %v2401_v6 = vpop.xlane.xlu0 %2400 }
 0x739   :  { %4636 = vrcp.f32 %v2401_v6 }
 0x73a   :  { %v4631_v8 = vpop.eup %4630 }
 0x73b   :  { %v2422_v50 = vmul.f32 %v4631_v8, %v4615_v24  ;;  %v2410_v48 = vpop.xlane.xlu1 %2409 }
 0x73c   :  { %4638 = vrcp.f32 %v2410_v48  ;;  %v2407_v9 = vpop.xlane.xlu0 %2406 }
 0x73d   :  { %4640 = vrcp.f32 %v2407_v9  ;;  %4400 = vmatmul.mubr.msk.f32.vlgmr.msra.gmra.mrb[34].mxu0 %vm1013_vm13, %v2422_v50 }
 0x73e   :  { %v4633_v56 = vpop.eup %4632  ;;  %4408 = vmatpush3.msra.mxu0 %v2583_v37  ;;  %4409 = vmatprep.mubr.msk.f32.mxu0 %vm4702_vm11, %v4701_v13 }
 0x73f   :  { %v2424_v11 = vmul.f32 %v4633_v56, %v4617_v25  ;;  %4417 = vmatprep.subr.mxu0 %v4701_v13  ;;  %v2963_v55 = vpop.permute.xlu1 %2962  ;;  %v384_v25 = vld [vmem:[%s5522_s4] sm:$0xff] }
 0x740   :  { %v2413_v14 = vpop.xlane.xlu0 %2412 }
 0x741   :  { %4642 = vrcp.f32 %v2413_v14  ;;  %4410 = vmatmul.mubr.msk.f32.vlgmr.msra.gmra.mrb[36].mxu0 %vm1013_vm13, %v2424_v11 }
 0x742   :  { %v4635_v58 = vpop.eup %4634  ;;  %4418 = vmatpush3.msra.mxu0 %v2735_v61  ;;  %4419 = vmatprep.mubr.msk.f32.mxu0 %vm4702_vm11, %v4701_v13 }
 0x743   :  { %v4637_v12 = vpop.eup %4636  ;;  %v2426_v16 = vmul.f32 %v4635_v58, %v4619_v30  ;;  %4427 = vmatprep.subr.mxu0 %v4701_v13 }
 0x744   :  { %v2425_v17 = vmul.f32 %v4637_v12, %v4621_v57  ;;  %v2887_v19 = vpop.permute.xlu0 %2886 }
 0x745   :  { %4420 = vmatmul.mubr.msk.f32.vlgmr.msra.gmra.mrb[38].mxu0 %vm1013_vm13, %v2426_v16 }
 0x746   :  { %v4639_v21 = vpop.eup %4638  ;;  %4415 = vmatmul.mubr.msk.f32.vlgmr.msra.gmra.mrb[32].mxu1 %vm1013_vm13, %v2425_v17  ;;  %4428 = vmatpush3.msra.mxu0 %v2887_v19 }
 0x747   :  { %v4641_v10 = vpop.eup %4640  ;;  %v2428_v20 = vmul.f32 %v4639_v21, %v4623_v3  ;;  %4423 = vmatpush3.msra.mxu1 %v2811_v60  ;;  %4424 = vmatprep.mubr.msk.f32.mxu1 %vm4702_vm11, %v4701_v13 }
 0x748   :  { %v2427_v24 = vmul.f32 %v4641_v10, %v4625_v29  ;;  %4429 = vmatprep.mubr.msk.f32.mxu0 %vm4702_vm11, %v4701_v13  ;;  %4432 = vmatprep.subr.mxu1 %v4701_v13 }
 0x749   :  { %4430 = vmatmul.mubr.msk.f32.vlgmr.msra.gmra.mrb[40].mxu0 %vm1013_vm13, %v2428_v20  ;;  %4530 = vmatprep.subr.bf16.mxu0 %v4529_v18 }
 0x74a   :  { %4425 = vmatmul.mubr.msk.f32.vlgmr.msra.gmra.mrb[34].mxu1 %vm1013_vm13, %v2427_v24  ;;  %4532 = vmatpush3.bf16.msra.mxu0 %v4529_v18 }
 0x74b   :  { %v4643_v22 = vpop.eup %4642  ;;  %4433 = vmatpush3.msra.mxu1 %v2963_v55  ;;  %4434 = vmatprep.mubr.msk.f32.mxu1 %vm4702_vm11, %v4701_v13  ;;  %v385_v13 = vld [vmem:[%s5522_s4 + $0x8] sm:$0xff] }
 0x74c   :  { %v2429_v59 = vmul.f32 %v4643_v22, %v5202_v34  ;;  %v4533_v26 = vpack.c.bf16 %v385_v13, %v384_v25 }
 0x74e   :  { %4435 = vmatmul.mubr.msk.f32.vlgmr.msra.gmra.mrb[36].mxu1 %vm1013_vm13, %v2429_v59  ;;  %4534 = vmatprep.subr.bf16.mxu0 %v4533_v26 }
 0x7e3   :  { %v2578_v63 = vpop.f32.mrb[30].mxu1 }
 0x7e4   :  { %v4406_v27 = vpop.f32.mrb[31].mxu1 }
 0x810   :  { %v2502_v30 = vpop.f32.mrb[34].mxu0 }
 0x811   :  { %v4401_v57 = vpop.f32.mrb[35].mxu0  ;;  %4441 = vmatprep.mubr.msk.f32.mxu0 %vm391_vm12, %v2502_v30 }
 0x812   :  { %4442 = vmatmul.mubr.msk.f32.vlgmr.msra.gmra.mrb[42].mxu0 %vm391_vm12, %v2578_v63 }
 0x813   :  { %4536 = vmatpush3.bf16.msra.mxu0 %v4533_v26 }
 0x814   :  { %v2654_v1 = vpop.f32.mrb[36].mxu0 }
 0x815   :  { %v4411_v2 = vpop.f32.mrb[37].mxu0  ;;  %4444 = vmatprep.mubr.msk.f32.mxu0 %vm391_vm12, %v2654_v1 }
 0x818   :  { %v2806_v3 = vpop.f32.mrb[38].mxu0 }
 0x819   :  { %v2730_v29 = vpop.f32.mrb[32].mxu1  ;;  %v4421_v31 = vpop.f32.mrb[39].mxu0 }
 0x81a   :  { %v4416_v32 = vpop.f32.mrb[33].mxu1  ;;  %4445 = vmatmul.mubr.msk.f32.gmra.mrb[44].mxu0 %vm391_vm12, %v2730_v29 }
 0x81b   :  { %4447 = vmatprep.mubr.msk.f32.mxu0 %vm391_vm12, %v2806_v3 }
 0x81c   :  { %v2958_v34 = vpop.f32.mrb[40].mxu0 }
 0x81d   :  { %v2882_v35 = vpop.f32.mrb[34].mxu1  ;;  %v4431_v61 = vpop.f32.mrb[41].mxu0 }
 0x81e   :  { %v4426_v0 = vpop.f32.mrb[35].mxu1  ;;  %4448 = vmatmul.mubr.msk.f32.gmra.mrb[46].mxu0 %vm391_vm12, %v2882_v35 }
 0x81f   :  { %4450 = vmatprep.mubr.msk.f32.mxu0 %vm391_vm12, %v2958_v34 }
 0x821   :  { %v3034_v37 = vpop.f32.mrb[36].mxu1 }
 0x822   :  { %v4436_v49 = vpop.f32.mrb[37].mxu1  ;;  %4451 = vmatmul.mubr.msk.f32.gmra.mrb[48].mxu0 %vm391_vm12, %v3034_v37 }
 0x823   :  { %4457 = vmatprep.mubr.msk.f32.mxu0 %vm391_vm12, %v5154_v36  ;;  %v4081_v36 = vld [vmem:[%s5523_s5] ss:$0 sm:$0xff] }
 0x826   :  { %4458 = vmatmul.mubr.msk.f32.vlgmr.msra.gmra.mrb[42].mxu0 %vm391_vm12, %v5156_v28 }
 0x827   :  { %4460 = vmatprep.mubr.msk.f32.mxu0 %vm391_vm12, %v5162_v5 }
 0x82a   :  { %4461 = vmatmul.mubr.msk.f32.gmra.mrb[44].mxu0 %vm391_vm12, %v5158_v51 }
 0x82b   :  { %4463 = vmatprep.mubr.msk.f32.mxu0 %vm391_vm12, %v5164_v7 }
 0x82e   :  { %4464 = vmatmul.mubr.msk.f32.gmra.mrb[46].mxu0 %vm391_vm12, %v5160_v33 }
 0x82f   :  { %4466 = vmatprep.mubr.msk.f32.mxu0 %vm391_vm12, %v5169_v53 }
 0x832   :  { %4467 = vmatmul.mubr.msk.f32.gmra.mrb[48].mxu0 %vm391_vm12, %v5166_v47 }
 0x8f9   :  { %v4459_v28 = vpop.f32.mrb[42].mxu0 }
 0x8fa   :  { %v3304_v5 = vadd.f32 %v4459_v28, %v4081_v36  ;;  %v3257_v4 = vpop.f32.mrb[43].mxu0 }
 0x8fb   :  { %v3303_v51 = vadd.f32 %v4081_v36, %v3257_v4 }
 0x8fc   :  { %v3312_v46 = vadd.f32 %v4847_v38, %v3304_v5 }
 0x8fd   :  { %v4462_v7 = vpop.f32.mrb[44].mxu0  ;;  %v3311_v60 = vadd.f32 %v3303_v51, %v4849_v39 }
 0x8fe   :  { %v3306_v33 = vadd.f32 %v4462_v7, %v4081_v36  ;;  %v3267_v54 = vpop.f32.mrb[45].mxu0  ;;  %v3324_v53 = vsel %vm254_vm10, %v3312_v46, 0.0 }
 0x8ff   :  { %v3305_v62 = vadd.f32 %v4081_v36, %v3267_v54  ;;  %3325 = vadd.xlane.f32.xlu1 %v3324_v53  ;;  %v3321_v47 = vsel %vm254_vm10, %v3311_v60, 0.0  ;;  %v3454_v54 = vld [vmem:[%s5526_s8] sm:$0xff]  ;;  %v3455_v53 = vld [vmem:[%s5526_s8 + $0x8] sm:$0xff] }
 0x900   :  { %3322 = vadd.xlane.f32.xlu0 %v3321_v47  ;;  %v3314_v52 = vadd.f32 %v4855_v40, %v3306_v33  ;;  %v3456_v47 = vld [vmem:[%s5526_s8 + $0x10] sm:$0xff] }
 0x901   :  { %v4465_v6 = vpop.f32.mrb[46].mxu0  ;;  %v3313_v8 = vadd.f32 %v3305_v62, %v4857_v41  ;;  %v4537_v62 = vpack.c.bf16 %v3455_v53, %v3454_v54 }
 0x902   :  { %v3308_v50 = vadd.f32 %v4465_v6, %v4081_v36  ;;  %v3277_v48 = vpop.f32.mrb[47].mxu0  ;;  %v3330_v16 = vsel %vm254_vm10, %v3314_v52, 0.0 }
 0x903   :  { %v3307_v38 = vadd.f32 %v4081_v36, %v3277_v48  ;;  %v3327_v9 = vsel %vm254_vm10, %v3313_v8, 0.0  ;;  %4538 = vmatprep.subr.bf16.mxu1 %v4537_v62 }
 0x904   :  { %3328 = vadd.xlane.f32.xlu0 %v3327_v9  ;;  %v3316_v39 = vadd.f32 %v4863_v42, %v3308_v50  ;;  %4540 = vmatpush3.bf16.msra.mxu1 %v4537_v62  ;;  %v3603_v50 = vld [vmem:[%s5528_s10 + $0x8] sm:$0xff] }
 0x905   :  { %v4468_v56 = vpop.f32.mrb[48].mxu0  ;;  %v3315_v11 = vadd.f32 %v3307_v38, %v4865_v43 }
 0x906   :  { %v3310_v14 = vadd.f32 %v4468_v56, %v4081_v36  ;;  %v3287_v58 = vpop.f32.mrb[49].mxu0  ;;  %v3336_v19 = vsel %vm254_vm10, %v3316_v39, 0.0 }
 0x907   :  { %v3309_v12 = vadd.f32 %v4081_v36, %v3287_v58  ;;  %v3333_v40 = vsel %vm254_vm10, %v3315_v11, 0.0 }
 0x908   :  { %3331 = vadd.xlane.f32.xlu0 %v3330_v16  ;;  %3334 = vadd.xlane.f32.xlu1 %v3333_v40  ;;  %v3318_v41 = vadd.f32 %v4871_v44, %v3310_v14 }
 0x909   :  { %v3317_v17 = vadd.f32 %v3309_v12, %v4873_v45 }
 0x90a   :  { %v3342_v43 = vsel %vm254_vm10, %v3318_v41, 0.0 }
 0x90b   :  { %v3339_v42 = vsel %vm254_vm10, %v3317_v17, 0.0 }
 0x90c   :  { %3337 = vadd.xlane.f32.xlu0 %v3336_v19  ;;  %3340 = vadd.xlane.f32.xlu1 %v3339_v42 }
 0x910   :  { %3343 = vadd.xlane.f32.xlu0 %v3342_v43 }
 0x98c   :  { %v3326_v21 = vpop.xlane.xlu1 %3325 }
 0x98d   :  { %v3347_v10 = vmul.f32 0.03125, %v3326_v21  ;;  %v3323_v20 = vpop.xlane.xlu0 %3322 }
 0x98e   :  { %v3346_v24 = vmul.f32 0.03125, %v3323_v20 }
 0x98f   :  { %v5291_v55 = vsub.f32 %v3312_v46, %v3347_v10 }
 0x990   :  { %v5293_v22 = vsub.f32 %v3311_v60, %v3346_v24 }
 0x991   :  { %v3329_v44 = vpop.xlane.xlu0 %3328  ;;  %v3363_v45 = vmul.f32 %v5291_v55, %v5291_v55 }
 0x992   :  { %v3348_v59 = vmul.f32 0.03125, %v3329_v44  ;;  %v3362_v15 = vmul.f32 %v5293_v22, %v5293_v22 }
 0x993   :  { %v3373_v23 = vsel %vm254_vm10, %v3363_v45, 0.0  ;;  %v4082_v45 = vld [vmem:[%s5524_s6] ss:$0 sm:$0xff] }
 0x994   :  { %v5300_v18 = vsub.f32 %v3313_v8, %v3348_v59  ;;  %3374 = vadd.xlane.f32.xlu0 %v3373_v23  ;;  %v3370_v25 = vsel %vm254_vm10, %v3362_v15, 0.0  ;;  %v3602_v8 = vld [vmem:[%s5528_s10] sm:$0xff] }
 0x995   :  { %v3332_v13 = vpop.xlane.xlu0 %3331  ;;  %v3335_v26 = vpop.xlane.xlu1 %3334  ;;  %3371 = vadd.xlane.f32.xlu1 %v3370_v25  ;;  %v4545_v48 = vpack.c.bf16 %v3603_v50, %v3602_v8 }
 0x996   :  { %v3349_v63 = vmul.f32 0.03125, %v3332_v13  ;;  %v3350_v27 = vmul.f32 0.03125, %v3335_v26  ;;  %v3364_v30 = vmul.f32 %v5300_v18, %v5300_v18 }
 0x998   :  { %v5305_v57 = vsub.f32 %v3314_v52, %v3349_v63  ;;  %v5307_v1 = vsub.f32 %v3315_v11, %v3350_v27  ;;  %v3376_v2 = vsel %vm254_vm10, %v3364_v30, 0.0  ;;  %v3457_v52 = vld [vmem:[%s5526_s8 + $0x18] sm:$0xff]  ;;  %v4083_v27 = vld [vmem:[%s5525_s7] ss:$0 sm:$0xff] }
 0x999   :  { %v3338_v3 = vpop.xlane.xlu0 %3337  ;;  %3377 = vadd.xlane.f32.xlu1 %v3376_v2  ;;  %v3341_v29 = vpop.xlane.xlu1 %3340  ;;  %v4541_v6 = vpack.c.bf16 %v3457_v52, %v3456_v47 }
 0x99a   :  { %v3351_v31 = vmul.f32 0.03125, %v3338_v3  ;;  %v3352_v32 = vmul.f32 0.03125, %v3341_v29  ;;  %v3365_v34 = vmul.f32 %v5305_v57, %v5305_v57  ;;  %v3366_v35 = vmul.f32 %v5307_v1, %v5307_v1  ;;  %v3604_v3 = vld [vmem:[%s5528_s10 + $0x10] sm:$0xff] }
 0x99b   :  { %4542 = vmatprep.subr.bf16.mxu1 %v4541_v6 }
 0x99c   :  { %v5314_v61 = vsub.f32 %v3316_v39, %v3351_v31  ;;  %v5316_v0 = vsub.f32 %v3317_v17, %v3352_v32  ;;  %v3379_v37 = vsel %vm254_vm10, %v3365_v34, 0.0  ;;  %v3382_v49 = vsel %vm254_vm10, %v3366_v35, 0.0  ;;  %4544 = vmatpush3.bf16.msra.mxu1 %v4541_v6 }
 0x99d   :  { %3380 = vadd.xlane.f32.xlu0 %v3379_v37  ;;  %v3344_v36 = vpop.xlane.xlu0 %3343  ;;  %3383 = vadd.xlane.f32.xlu1 %v3382_v49  ;;  %v3606_v49 = vld [vmem:[%s5528_s10 + $0x20] sm:$0xff] }
 0x99e   :  { %v3353_v28 = vmul.f32 0.03125, %v3344_v36  ;;  %v3367_v5 = vmul.f32 %v5314_v61, %v5314_v61  ;;  %v3368_v4 = vmul.f32 %v5316_v0, %v5316_v0  ;;  %4546 = vmatprep.subr.bf16.mxu1 %v4545_v48  ;;  %v3607_v36 = vld [vmem:[%s5528_s10 + $0x28] sm:$0xff] }
 0x9a0   :  { %v5324_v51 = vsub.f32 %v3318_v41, %v3353_v28  ;;  %v3385_v46 = vsel %vm254_vm10, %v3367_v5, 0.0  ;;  %v3388_v7 = vsel %vm254_vm10, %v3368_v4, 0.0 }
 0x9a1   :  { %3386 = vadd.xlane.f32.xlu0 %v3385_v46  ;;  %3389 = vadd.xlane.f32.xlu1 %v3388_v7  ;;  %v4553_v7 = vpack.c.bf16 %v3607_v36, %v3606_v49 }
 0x9a2   :  { %v3369_v60 = vmul.f32 %v5324_v51, %v5324_v51 }
 0x9a4   :  { %v3391_v33 = vsel %vm254_vm10, %v3369_v60, 0.0 }
 0x9a5   :  { %3392 = vadd.xlane.f32.xlu0 %v3391_v33 }
 0xa21   :  { %v3375_v38 = vpop.xlane.xlu0 %3374 }
 0xa22   :  { %v3395_v9 = vmul.f32 0.03125, %v3375_v38  ;;  %v3372_v39 = vpop.xlane.xlu1 %3371 }
 0xa23   :  { %v3394_v56 = vmul.f32 0.03125, %v3372_v39 }
 0xa24   :  { %v3403_v11 = vadd.f32 1e-05, %v3395_v9  ;;  %v3608_v9 = vld [vmem:[%s5528_s10 + $0x30] sm:$0xff] }
 0xa25   :  { %v3402_v14 = vadd.f32 1e-05, %v3394_v56  ;;  %v4084_v56 = vld [vmem:[%s5527_s9] ss:$0 sm:$0xff] }
 0xa26   :  { %4644 = vrsqrt.f32 %v3403_v11  ;;  %v3378_v58 = vpop.xlane.xlu1 %3377 }
 0xa27   :  { %4646 = vrsqrt.f32 %v3402_v14  ;;  %v3396_v12 = vmul.f32 0.03125, %v3378_v58 }
 0xa29   :  { %v3404_v16 = vadd.f32 1e-05, %v3396_v12 }
 0xa2a   :  { %v3381_v40 = vpop.xlane.xlu0 %3380  ;;  %v3384_v41 = vpop.xlane.xlu1 %3383 }
 0xa2b   :  { %4648 = vrsqrt.f32 %v3404_v16  ;;  %v3397_v17 = vmul.f32 0.03125, %v3381_v40  ;;  %v3398_v19 = vmul.f32 0.03125, %v3384_v41 }
 0xa2d   :  { %v3405_v42 = vadd.f32 1e-05, %v3397_v17  ;;  %v3406_v43 = vadd.f32 1e-05, %v3398_v19 }
 0xa2e   :  { %v3387_v21 = vpop.xlane.xlu0 %3386  ;;  %v3390_v10 = vpop.xlane.xlu1 %3389 }
 0xa2f   :  { %4650 = vrsqrt.f32 %v3405_v42  ;;  %v3399_v20 = vmul.f32 0.03125, %v3387_v21  ;;  %v3400_v24 = vmul.f32 0.03125, %v3390_v10 }
 0xa30   :  { %v4645_v44 = vpop.eup %4644  ;;  %4652 = vrsqrt.f32 %v3406_v43 }
 0xa31   :  { %v4647_v59 = vpop.eup %4646  ;;  %v3419_v15 = vmul.f32 %v4645_v44, %v5291_v55  ;;  %v3407_v23 = vadd.f32 1e-05, %v3399_v20  ;;  %v3408_v25 = vadd.f32 1e-05, %v3400_v24  ;;  %v3605_v55 = vld [vmem:[%s5528_s10 + $0x18] sm:$0xff] }
 0xa32   :  { %v3393_v13 = vpop.xlane.xlu0 %3392  ;;  %v3418_v26 = vmul.f32 %v4647_v59, %v5293_v22  ;;  %v4549_v35 = vpack.c.bf16 %v3605_v55, %v3604_v3 }
 0xa33   :  { %4654 = vrsqrt.f32 %v3407_v23  ;;  %v3401_v63 = vmul.f32 0.03125, %v3393_v13  ;;  %v3433_v30 = vmul.f32 %v4082_v45, %v3419_v15 }
 0xa34   :  { %4656 = vrsqrt.f32 %v3408_v25  ;;  %v3432_v2 = vmul.f32 %v4082_v45, %v3418_v26 }
 0xa35   :  { %v4649_v29 = vpop.eup %4648  ;;  %v3409_v31 = vadd.f32 1e-05, %v3401_v63  ;;  %v5366_v34 = vadd.f32 %v4083_v27, %v3433_v30 }
 0xa36   :  { %v5363_v22 = vadd.f32 %v4083_v27, %v3432_v2  ;;  %v3420_v32 = vmul.f32 %v4649_v29, %v5300_v18 }
 0xa37   :  { %4658 = vrsqrt.f32 %v3409_v31 }
 0xa38   :  { %4477 = vmatprep.mubr.msk.f32.mxu1 %vm254_vm10, %v5363_v22  ;;  %v3434_v37 = vmul.f32 %v4082_v45, %v3420_v32 }
 0xa39   :  { %v4651_v28 = vpop.eup %4650  ;;  %4478 = vmatmul.mubr.msk.f32.vlgmr.msra.gmra.mrb[38].mxu1 %vm254_vm10, %v5366_v34 }
 0xa3a   :  { %v4653_v18 = vpop.eup %4652  ;;  %v5378_v5 = vadd.f32 %v4083_v27, %v3434_v37  ;;  %v3421_v4 = vmul.f32 %v4651_v28, %v5305_v57  ;;  %4548 = vmatpush3.bf16.msra.mxu1 %v4545_v48 }
 0xa3b   :  { %v3422_v46 = vmul.f32 %v4653_v18, %v5307_v1  ;;  %4550 = vmatprep.subr.bf16.mxu1 %v4549_v35 }
 0xa3c   :  { %4480 = vmatprep.mubr.msk.f32.mxu1 %vm254_vm10, %v5378_v5  ;;  %v3435_v60 = vmul.f32 %v4082_v45, %v3421_v4 }
 0xa3d   :  { %v4655_v33 = vpop.eup %4654  ;;  %v3436_v54 = vmul.f32 %v4082_v45, %v3422_v46 }
 0xa3e   :  { %v4657_v53 = vpop.eup %4656  ;;  %v5384_v62 = vadd.f32 %v4083_v27, %v3435_v60  ;;  %v3423_v47 = vmul.f32 %v4655_v33, %v5314_v61  ;;  %4552 = vmatpush3.bf16.msra.mxu1 %v4549_v35 }
 0xa3f   :  { %v5387_v52 = vadd.f32 %v4083_v27, %v3436_v54  ;;  %v3424_v57 = vmul.f32 %v4657_v53, %v5316_v0  ;;  %4554 = vmatprep.subr.bf16.mxu1 %v4553_v7 }
 0xa40   :  { %4481 = vmatmul.mubr.msk.f32.gmra.mrb[40].mxu1 %vm254_vm10, %v5384_v62  ;;  %v3437_v1 = vmul.f32 %v4082_v45, %v3423_v47 }
 0xa41   :  { %v4659_v6 = vpop.eup %4658  ;;  %4483 = vmatprep.mubr.msk.f32.mxu1 %vm254_vm10, %v5387_v52  ;;  %v3438_v8 = vmul.f32 %v4082_v45, %v3424_v57 }
 0xa42   :  { %v5394_v50 = vadd.f32 %v4083_v27, %v3437_v1  ;;  %v3425_v48 = vmul.f32 %v4659_v6, %v5324_v51  ;;  %4556 = vmatpush3.bf16.msra.mxu1 %v4553_v7  ;;  %v3609_v51 = vld [vmem:[%s5528_s10 + $0x38] sm:$0xff] }
 0xa43   :  { %v5397_v61 = vadd.f32 %v4083_v27, %v3438_v8  ;;  %v4557_v39 = vpack.c.bf16 %v3609_v51, %v3608_v9 }
 0xa44   :  { %4484 = vmatmul.mubr.msk.f32.gmra.mrb[42].mxu1 %vm254_vm10, %v5394_v50  ;;  %v3439_v0 = vmul.f32 %v4082_v45, %v3425_v48 }
 0xa45   :  { %4486 = vmatprep.mubr.msk.f32.mxu1 %vm254_vm10, %v5397_v61  ;;  %4558 = vmatprep.subr.bf16.mxu1 %v4557_v39 }
 0xa46   :  { %v5403_v38 = vadd.f32 %v4083_v27, %v3439_v0  ;;  %4560 = vmatpush3.bf16.msra.mxu1 %v4557_v39  ;;  %v4093_v27 = vld [vmem:[%s5529_s11] ss:$0 sm:$0xff] }
 0xa48   :  { %4487 = vmatmul.mubr.msk.f32.gmra.mrb[44].mxu1 %vm254_vm10, %v5403_v38 }
 0xb0c   :  { %v4479_v11 = vpop.f32.mrb[38].mxu1 }
 0xb0d   :  { %v3561_v14 = vadd.f32 %v4479_v11, %v4084_v56  ;;  %v3555_v58 = vpop.f32.mrb[39].mxu1 }
 0xb0e   :  { %v3556_v12 = vadd.f32 %v4084_v56, %v3555_v58 }
 0xb0f   :  { %v3595_v40 = vmax.f32 %v3561_v14, 0.0 }
 0xb10   :  { %v3594_v16 = vmax.f32 %v3556_v12, 0.0 }
 0xb12   :  { %4505 = vmatprep.mubr.msk.f32.mxu1 %vm3617_vm14, %v3594_v16 }
 0xb13   :  { %v4482_v41 = vpop.f32.mrb[40].mxu1  ;;  %4506 = vmatmul.mubr.msk.f32.vlgmr.msra.gmra.mrb[46].mxu1 %vm3617_vm14, %v3595_v40 }
 0xb14   :  { %v3571_v17 = vadd.f32 %v4482_v41, %v4084_v56  ;;  %v3565_v19 = vpop.f32.mrb[41].mxu1 }
 0xb15   :  { %v3566_v42 = vadd.f32 %v4084_v56, %v3565_v19 }
 0xb16   :  { %v3597_v10 = vmax.f32 %v3571_v17, 0.0 }
 0xb17   :  { %v3596_v43 = vmax.f32 %v3566_v42, 0.0  ;;  %v4485_v21 = vpop.f32.mrb[42].mxu1 }
 0xb18   :  { %v3581_v20 = vadd.f32 %v4485_v21, %v4084_v56  ;;  %v3575_v24 = vpop.f32.mrb[43].mxu1 }
 0xb19   :  { %v3576_v44 = vadd.f32 %v4084_v56, %v3575_v24  ;;  %4508 = vmatprep.mubr.msk.f32.mxu1 %vm3617_vm14, %v3596_v43 }
 0xb1a   :  { %4509 = vmatmul.mubr.msk.f32.gmra.mrb[48].mxu1 %vm3617_vm14, %v3597_v10  ;;  %v3599_v15 = vmax.f32 %v3581_v20, 0.0 }
 0xb1b   :  { %v3598_v45 = vmax.f32 %v3576_v44, 0.0  ;;  %v4488_v59 = vpop.f32.mrb[44].mxu1 }
 0xb1c   :  { %v3591_v23 = vadd.f32 %v4488_v59, %v4084_v56  ;;  %v3585_v25 = vpop.f32.mrb[45].mxu1 }
 0xb1d   :  { %v3586_v13 = vadd.f32 %v4084_v56, %v3585_v25  ;;  %4511 = vmatprep.mubr.msk.f32.mxu1 %vm3617_vm14, %v3598_v45 }
 0xb1e   :  { %4512 = vmatmul.mubr.msk.f32.gmra.mrb[50].mxu1 %vm3617_vm14, %v3599_v15  ;;  %v3601_v63 = vmax.f32 %v3591_v23, 0.0 }
 0xb1f   :  { %v3600_v26 = vmax.f32 %v3586_v13, 0.0 }
 0xb21   :  { %4514 = vmatprep.mubr.msk.f32.mxu1 %vm3617_vm14, %v3600_v26 }
 0xb22   :  { %4515 = vmatmul.mubr.msk.f32.gmra.mrb[52].mxu1 %vm3617_vm14, %v3601_v63 }
 0xbe6   :  { %v4507_v30 = vpop.f32.mrb[46].mxu1 }
 0xbe7   :  { %v3714_v2 = vadd.f32 %v4507_v30, %v4093_v27  ;;  %v3708_v3 = vpop.f32.mrb[47].mxu1 }
 0xbe8   :  { %v3709_v55 = vadd.f32 %v4093_v27, %v3708_v3 }
 0xbe9   :  { %v3748_v29 = vadd.f32 %v3714_v2, %v5366_v34 }
 0xbea   :  { %v3747_v31 = vadd.f32 %v3709_v55, %v5363_v22 }
 0xbeb   :  { %v3760_v32 = vsel %vm254_vm10, %v3748_v29, 0.0 }
 0xbec   :  { %3761 = vadd.xlane.f32.xlu0 %v3760_v32  ;;  %v3757_v35 = vsel %vm254_vm10, %v3747_v31, 0.0 }
 0xbed   :  { %v4510_v37 = vpop.f32.mrb[48].mxu1  ;;  %3758 = vadd.xlane.f32.xlu1 %v3757_v35 }
 0xbee   :  { %v3724_v49 = vadd.f32 %v4510_v37, %v4093_v27  ;;  %v3718_v36 = vpop.f32.mrb[49].mxu1 }
 0xbef   :  { %v3719_v28 = vadd.f32 %v4093_v27, %v3718_v36 }
 0xbf0   :  { %v3750_v18 = vadd.f32 %v3724_v49, %v5384_v62 }
 0xbf1   :  { %v4513_v4 = vpop.f32.mrb[50].mxu1  ;;  %v3749_v46 = vadd.f32 %v3719_v28, %v5378_v5 }
 0xbf2   :  { %v3734_v7 = vadd.f32 %v4513_v4, %v4093_v27  ;;  %v3728_v60 = vpop.f32.mrb[51].mxu1  ;;  %v3766_v34 = vsel %vm254_vm10, %v3750_v18, 0.0 }
 0xbf3   :  { %v3729_v22 = vadd.f32 %v4093_v27, %v3728_v60  ;;  %3767 = vadd.xlane.f32.xlu0 %v3766_v34  ;;  %v3763_v33 = vsel %vm254_vm10, %v3749_v46, 0.0 }
 0xbf4   :  { %v3752_v54 = vadd.f32 %v3734_v7, %v5394_v50  ;;  %3764 = vadd.xlane.f32.xlu1 %v3763_v33 }
 0xbf5   :  { %v3751_v53 = vadd.f32 %v3729_v22, %v5387_v52  ;;  %v4516_v47 = vpop.f32.mrb[52].mxu1 }
 0xbf6   :  { %v3744_v57 = vadd.f32 %v4516_v47, %v4093_v27  ;;  %v3738_v1 = vpop.f32.mrb[53].mxu1  ;;  %v3772_v62 = vsel %vm254_vm10, %v3752_v54, 0.0 }
 0xbf7   :  { %v3739_v6 = vadd.f32 %v4093_v27, %v3738_v1  ;;  %3773 = vadd.xlane.f32.xlu0 %v3772_v62  ;;  %v3769_v5 = vsel %vm254_vm10, %v3751_v53, 0.0 }
 0xbf8   :  { %v3754_v8 = vadd.f32 %v3744_v57, %v5403_v38  ;;  %3770 = vadd.xlane.f32.xlu1 %v3769_v5 }
 0xbf9   :  { %v3753_v48 = vadd.f32 %v3739_v6, %v5397_v61  ;;  %v4102_v6 = vld [vmem:[%s5530_s12] ss:$0 sm:$0xff]  ;;  %s4708_s12 = smov [#allocation2]  }
 0xbfa   :  { %v3778_v0 = vsel %vm254_vm10, %v3754_v8, 0.0 }
 0xbfb   :  { %3779 = vadd.xlane.f32.xlu0 %v3778_v0  ;;  %v3775_v50 = vsel %vm254_vm10, %v3753_v48, 0.0 }
 0xbfc   :  { %3776 = vadd.xlane.f32.xlu1 %v3775_v50 }
 0xc79   :  { %v3762_v52 = vpop.xlane.xlu0 %3761 }
 0xc7a   :  { %v3782_v9 = vmul.f32 0.03125, %v3762_v52  ;;  %v3759_v51 = vpop.xlane.xlu1 %3758 }
 0xc7b   :  { %v3781_v39 = vmul.f32 0.03125, %v3759_v51 }
 0xc7c   :  { %v5443_v56 = vsub.f32 %v3748_v29, %v3782_v9  ;;  %v4103_v9 = vld [vmem:[%s5531_s13] ss:$0 sm:$0xff]  ;;  %s3983_s13 = sshll.u32 %s4708_s12, 4  ;;  %s3984_s13 = int_to_ptr.vmem [resolvable:$true] %s3983_s13 }
 0xc7d   :  { %v5445_v11 = vsub.f32 %v3747_v31, %v3781_v39  ;;  %s4676_s3 = scalar_lea.vmem %s3984_s13, 128  ;;  %p4681_p1 = scmp.lt.s32.totalorder %s3984_s13, %s3984_s13 }
 0xc7e   :  { %v3798_v38 = vmul.f32 %v5443_v56, %v5443_v56  ;;  %p4677_p0 = scmp.ne.s32.totalorder %s3984_s13, %s4676_s3  ;;  %p4682_p2 = scmp.lt.s32.totalorder %s4676_s3, %s4676_s3 }
 0xc7f   :  { %v3797_v61 = vmul.f32 %v5445_v11, %v5445_v11 }
 0xc80   :  { %v3768_v14 = vpop.xlane.xlu0 %3767  ;;  %v3808_v58 = vsel %vm254_vm10, %v3798_v38, 0.0  ;;  %p4683_p3 = por %p4682_p2, %p4681_p1 }
 0xc81   :  { %v3784_v12 = vmul.f32 0.03125, %v3768_v14  ;;  %v3765_v16 = vpop.xlane.xlu1 %3764  ;;  %3809 = vadd.xlane.f32.xlu0 %v3808_v58  ;;  %v3805_v40 = vsel %vm254_vm10, %v3797_v61, 0.0 }
 0xc82   :  { %v3783_v41 = vmul.f32 0.03125, %v3765_v16  ;;  %3806 = vadd.xlane.f32.xlu1 %v3805_v40  ;;  %p4684_p4 = pnand %p4683_p3, %p4677_p0 }
 0xc83   :  { %v5453_v17 = vsub.f32 %v3750_v18, %v3784_v12 }
 0xc84   :  { %v5455_v19 = vsub.f32 %v3749_v46, %v3783_v41  ;;  %v3774_v42 = vpop.xlane.xlu0 %3773 }
 0xc85   :  { %v3786_v43 = vmul.f32 0.03125, %v3774_v42  ;;  %v3771_v21 = vpop.xlane.xlu1 %3770  ;;  %v3800_v10 = vmul.f32 %v5453_v17, %v5453_v17 }
 0xc86   :  { %v3785_v20 = vmul.f32 0.03125, %v3771_v21  ;;  %v3799_v24 = vmul.f32 %v5455_v19, %v5455_v19 }
 0xc87   :  { %v5461_v44 = vsub.f32 %v3752_v54, %v3786_v43  ;;  %v3814_v45 = vsel %vm254_vm10, %v3800_v10, 0.0 }
 0xc88   :  { %v5464_v59 = vsub.f32 %v3751_v53, %v3785_v20  ;;  %3815 = vadd.xlane.f32.xlu0 %v3814_v45  ;;  %v3780_v15 = vpop.xlane.xlu0 %3779  ;;  %v3811_v23 = vsel %vm254_vm10, %v3799_v24, 0.0 }
 0xc89   :  { %v3788_v25 = vmul.f32 0.03125, %v3780_v15  ;;  %3812 = vadd.xlane.f32.xlu1 %v3811_v23  ;;  %v3777_v13 = vpop.xlane.xlu1 %3776  ;;  %v3802_v26 = vmul.f32 %v5461_v44, %v5461_v44 }
 0xc8a   :  { %v3787_v63 = vmul.f32 0.03125, %v3777_v13  ;;  %v3801_v27 = vmul.f32 %v5464_v59, %v5464_v59 }
 0xc8b   :  { %v5471_v30 = vsub.f32 %v3754_v8, %v3788_v25  ;;  %v3820_v2 = vsel %vm254_vm10, %v3802_v26, 0.0 }
 0xc8c   :  { %v5474_v3 = vsub.f32 %v3753_v48, %v3787_v63  ;;  %3821 = vadd.xlane.f32.xlu0 %v3820_v2  ;;  %v3817_v55 = vsel %vm254_vm10, %v3801_v27, 0.0 }
 0xc8d   :  { %3818 = vadd.xlane.f32.xlu1 %v3817_v55  ;;  %v3804_v29 = vmul.f32 %v5471_v30, %v5471_v30 }
 0xc8e   :  { %v3803_v31 = vmul.f32 %v5474_v3, %v5474_v3 }
 0xc8f   :  { %v3826_v32 = vsel %vm254_vm10, %v3804_v29, 0.0 }
 0xc90   :  { %3827 = vadd.xlane.f32.xlu0 %v3826_v32  ;;  %v3823_v35 = vsel %vm254_vm10, %v3803_v31, 0.0 }
 0xc91   :  { %3824 = vadd.xlane.f32.xlu1 %v3823_v35 }
 0xd0e   :  { %v3810_v37 = vpop.xlane.xlu0 %3809 }
 0xd0f   :  { %v3830_v49 = vmul.f32 0.03125, %v3810_v37  ;;  %v3807_v36 = vpop.xlane.xlu1 %3806 }
 0xd10   :  { %v3829_v28 = vmul.f32 0.03125, %v3807_v36 }
 0xd11   :  { %v3838_v18 = vadd.f32 1e-05, %v3830_v49 }
 0xd12   :  { %v3837_v4 = vadd.f32 1e-05, %v3829_v28 }
 0xd13   :  { %4660 = vrsqrt.f32 %v3838_v18 }
 0xd14   :  { %4662 = vrsqrt.f32 %v3837_v4 }
 0xd15   :  { %v3816_v46 = vpop.xlane.xlu0 %3815 }
 0xd16   :  { %v3832_v7 = vmul.f32 0.03125, %v3816_v46  ;;  %v3813_v60 = vpop.xlane.xlu1 %3812 }
 0xd17   :  { %v3831_v34 = vmul.f32 0.03125, %v3813_v60 }
 0xd18   :  { %v3840_v22 = vadd.f32 1e-05, %v3832_v7 }
 0xd19   :  { %v3839_v33 = vadd.f32 1e-05, %v3831_v34  ;;  %v3822_v54 = vpop.xlane.xlu0 %3821 }
 0xd1a   :  { %4664 = vrsqrt.f32 %v3840_v22  ;;  %v3834_v53 = vmul.f32 0.03125, %v3822_v54  ;;  %v3819_v47 = vpop.xlane.xlu1 %3818 }
 0xd1b   :  { %4666 = vrsqrt.f32 %v3839_v33  ;;  %v3833_v57 = vmul.f32 0.03125, %v3819_v47 }
 0xd1c   :  { %v3842_v1 = vadd.f32 1e-05, %v3834_v53 }
 0xd1d   :  { %v4661_v62 = vpop.eup %4660  ;;  %v3841_v5 = vadd.f32 1e-05, %v3833_v57  ;;  %v3828_v8 = vpop.xlane.xlu0 %3827 }
 0xd1e   :  { %v4663_v48 = vpop.eup %4662  ;;  %v3854_v0 = vmul.f32 %v4661_v62, %v5443_v56  ;;  %4668 = vrsqrt.f32 %v3842_v1  ;;  %v3836_v50 = vmul.f32 0.03125, %v3828_v8  ;;  %v3825_v52 = vpop.xlane.xlu1 %3824 }
 0xd1f   :  { %v3853_v51 = vmul.f32 %v4663_v48, %v5445_v11  ;;  %4670 = vrsqrt.f32 %v3841_v5  ;;  %v3835_v39 = vmul.f32 0.03125, %v3825_v52 }
 0xd20   :  { %v3868_v38 = vmul.f32 %v4102_v6, %v3854_v0  ;;  %v3844_v61 = vadd.f32 1e-05, %v3836_v50 }
 0xd21   :  { %v3867_v14 = vmul.f32 %v4102_v6, %v3853_v51  ;;  %v3843_v58 = vadd.f32 1e-05, %v3835_v39 }
 0xd22   :  { %v3882_v12 = vadd.f32 %v4103_v9, %v3868_v38  ;;  %4672 = vrsqrt.f32 %v3844_v61 }
 0xd23   :  { %v3881_v16 = vadd.f32 %v4103_v9, %v3867_v14  ;;  %4674 = vrsqrt.f32 %v3843_v58 }
 0xd24   :  { %v4665_v56 = vpop.eup %4664  ;;  %v3896_v40 = vsel %vm254_vm10, %v3882_v12, 0.0 }
 0xd25   :  { %v4667_v41 = vpop.eup %4666  ;;  %v3897_v42 = vrot.slane %v3896_v40, 4  ;;  %v3889_v43 = vsel %vm254_vm10, %v3881_v16, 0.0  ;;  %v3856_v21 = vmul.f32 %v4665_v56, %v5453_v17 }
 0xd26   :  { %v3890_v11 = vrot.slane %v3889_v43, 4  ;;  %v3855_v10 = vmul.f32 %v4667_v41, %v5455_v19 }
 0xd27   :  { %v3898_v20 = vadd.f32 %v3897_v42, %v3896_v40  ;;  %v3870_v24 = vmul.f32 %v4102_v6, %v3856_v21 }
 0xd28   :  { %v4669_v45 = vpop.eup %4668  ;;  %v3891_v15 = vadd.f32 %v3890_v11, %v3889_v43  ;;  %v3869_v23 = vmul.f32 %v4102_v6, %v3855_v10 }
 0xd29   :  { %v4671_v25 = vpop.eup %4670  ;;  %v3899_v13 = vrot.slane %v3898_v20, 2  ;;  %v3884_v26 = vadd.f32 %v4103_v9, %v3870_v24  ;;  %v3858_v63 = vmul.f32 %v4669_v45, %v5461_v44 }
 0xd2a   :  { %v3892_v27 = vrot.slane %v3891_v15, 2  ;;  %v3883_v2 = vadd.f32 %v4103_v9, %v3869_v23  ;;  %v3857_v55 = vmul.f32 %v4671_v25, %v5464_v59 }
 0xd2b   :  { %v3900_v29 = vadd.f32 %v3899_v13, %v3898_v20  ;;  %v3910_v17 = vsel %vm254_vm10, %v3884_v26, 0.0  ;;  %v3872_v31 = vmul.f32 %v4102_v6, %v3858_v63 }
 0xd2c   :  { %v4673_v32 = vpop.eup %4672  ;;  %v3893_v19 = vadd.f32 %v3892_v27, %v3891_v15  ;;  %v3911_v35 = vrot.slane %v3910_v17, 4  ;;  %v3903_v37 = vsel %vm254_vm10, %v3883_v2, 0.0  ;;  %v3871_v49 = vmul.f32 %v4102_v6, %v3857_v55 }
 0xd2d   :  { %v4675_v36 = vpop.eup %4674  ;;  %v3904_v28 = vrot.slane %v3903_v37, 4  ;;  %v3886_v18 = vadd.f32 %v4103_v9, %v3872_v31  ;;  %v3860_v4 = vmul.f32 %v4673_v32, %v5471_v30  ;;  %v3901_v44 = vrot.slane %v3900_v29, 1 }
 0xd2e   :  { %v3912_v46 = vadd.f32 %v3911_v35, %v3910_v17  ;;  %v3885_v7 = vadd.f32 %v4103_v9, %v3871_v49  ;;  %v3859_v59 = vmul.f32 %v4675_v36, %v5474_v3  ;;  %v3894_v60 = vrot.slane %v3893_v19, 1 }
 0xd2f   :  { %v3905_v34 = vadd.f32 %v3904_v28, %v3903_v37  ;;  %v3874_v22 = vmul.f32 %v4102_v6, %v3860_v4  ;;  %v3924_v33 = vsel %vm254_vm10, %v3886_v18, 0.0  ;;  %v3902_v48 = vadd.f32 %v3901_v44, %v3900_v29 }
 0xd30   :  { %v3917_v54 = vsel %vm254_vm10, %v3885_v7, 0.0  ;;  %v3873_v53 = vmul.f32 %v4102_v6, %v3859_v59  ;;  %v3913_v47 = vrot.slane %v3912_v46, 2  ;;  %v3925_v5 = vrot.slane %v3924_v33, 4 }
 0xd31   :  { %v3906_v57 = vrot.slane %v3905_v34, 2  ;;  %v3918_v1 = vrot.slane %v3917_v54, 4  ;;  %v3888_v62 = vadd.f32 %v4103_v9, %v3874_v22  ;;  %v3895_v30 = vadd.f32 %v3894_v60, %v3893_v19 }
 0xd32   :  { %v3887_v8 = vadd.f32 %v4103_v9, %v3873_v53  ;;  %v3914_v0 = vadd.f32 %v3913_v47, %v3912_v46  ;;  %v3926_v3 = vadd.f32 %v3925_v5, %v3924_v33  ;;  %v3946_v40 = vmul.f32 0.125, %v3902_v48 }
 0xd33   :  { %v3907_v50 = vadd.f32 %v3906_v57, %v3905_v34  ;;  %v3919_v52 = vadd.f32 %v3918_v1, %v3917_v54  ;;  %v3938_v51 = vsel %vm254_vm10, %v3888_v62, 0.0  ;;  %v3945_v56 = vmul.f32 0.125, %v3895_v30 }
 0xd34   :  { %v3915_v39 = vrot.slane %v3914_v0, 1  ;;  %v3931_v38 = vsel %vm254_vm10, %v3887_v8, 0.0  ;;  %v3939_v61 = vrot.slane %v3938_v51, 4  ;;  %v3927_v58 = vrot.slane %v3926_v3, 2 }
 0xd35   :  { %v3908_v14 = vrot.slane %v3907_v50, 1  ;;  %v3920_v6 = vrot.slane %v3919_v52, 2  ;;  %v3932_v12 = vrot.slane %v3931_v38, 4  ;;  %v3962_v23 = vsel %vm3961_vm15, %v3946_v40, %v3945_v56 }
 0xd36   :  { %v3940_v16 = vadd.f32 %v3939_v61, %v3938_v51  ;;  %v3928_v42 = vadd.f32 %v3927_v58, %v3926_v3  ;;  %v3916_v21 = vadd.f32 %v3915_v39, %v3914_v0 }
 0xd37   :  { %v3909_v9 = vadd.f32 %v3908_v14, %v3907_v50  ;;  %v3921_v41 = vadd.f32 %v3920_v6, %v3919_v52  ;;  %v3933_v43 = vadd.f32 %v3932_v12, %v3931_v38 }
 0xd38   :  { %v3941_v11 = vrot.slane %v3940_v16, 2  ;;  %v3929_v20 = vrot.slane %v3928_v42, 1  ;;  %v3948_v2 = vmul.f32 0.125, %v3916_v21 }
 0xd39   :  { %v3922_v10 = vrot.slane %v3921_v41, 1  ;;  %v3934_v24 = vrot.slane %v3933_v43, 2  ;;  %v3947_v45 = vmul.f32 0.125, %v3909_v9 }
 0xd3a   :  { %v3942_v15 = vadd.f32 %v3941_v11, %v3940_v16  ;;  %v3930_v63 = vadd.f32 %v3929_v20, %v3928_v42 }
 0xd3b   :  { %v3923_v25 = vadd.f32 %v3922_v10, %v3921_v41  ;;  %v3935_v13 = vadd.f32 %v3934_v24, %v3933_v43  ;;  %v3964_v26 = vsel %vm3963_vm0, %v3947_v45, %v3962_v23 }
 0xd3c   :  { %v3943_v27 = vrot.slane %v3942_v15, 1  ;;  %v3966_v31 = vsel %vm3965_vm1, %v3948_v2, %v3964_v26  ;;  %v3950_v35 = vmul.f32 0.125, %v3930_v63 }
 0xd3d   :  { %v3936_v55 = vrot.slane %v3935_v13, 1  ;;  %v3949_v29 = vmul.f32 0.125, %v3923_v25 }
 0xd3e   :  { %v3944_v17 = vadd.f32 %v3943_v27, %v3942_v15 }
 0xd3f   :  { %v3937_v32 = vadd.f32 %v3936_v55, %v3935_v13  ;;  %v3968_v19 = vsel %vm3967_vm2, %v3949_v29, %v3966_v31 }
 0xd40   :  { %v3952_v49 = vmul.f32 0.125, %v3944_v17  ;;  %v3970_v36 = vsel %vm3969_vm3, %v3950_v35, %v3968_v19 }
 0xd41   :  { %v3951_v37 = vmul.f32 0.125, %v3937_v32 }
 0xd43   :  { %v3972_v28 = vsel %vm3971_vm4, %v3951_v37, %v3970_v36 }
 0xd44   :  { %v3974_v18 = vsel %vm3973_vm5, %v3952_v49, %v3972_v28 }
 0xd45   :  { %3976 = vst.msk [vmem:[#allocation2] sm:$0xff] %vm254_vm10, %v3974_v18 }
 0xd46   :  { %4687 = shalt.err (!%p4684_p4)
}
 0xd47   :  { %s4688_s29 = scalar_lea.hbm %s5532_s14, 128 }
 0xd48   :  { %p4689_p5 = scmp.ne.s32.totalorder %s5532_s14, %s4688_s29  ;;  %p4692_p6 = scmp.lt.u32.totalorder %s4688_s29, %s5532_s14 }
 0xd4a   :  { %p4694_p7 = pnand %p4692_p6, %p4689_p5 }
 0xd4c   :  { %4697 = shalt.err (!%p4694_p7)
}
 0xd4d   :  { %3986 = dma.vmem_to_hbm [thread:$0]  %s3984_s13, 128, %s5532_s14, [#allocation3]  }
 0xd4e   :  { %4698 = dma.done.wait [#allocation3], 128  }
 0xd4f   :  { %4699 = vsyncadd [#allocation3], 4294967168 }
 0xd50   :  { %3990 = vsyncpa [#allocation3], 1 }

</bundles_post_ra>
